<compile_context>
chip_gen: v7x
topology: tpu7x:2x2x1
jax: 0.10.0
libtpu: 0.0.40
codegen_flags: <defaults>
</compile_context>

<pallas_src>
import math

import jax
import jax.numpy as jnp
import numpy as np
from jax import lax
from jax.experimental import pallas as pl
from jax.experimental.pallas import tpu as pltpu

N_HEAD = 4
IN_FEAT = 32
PER_HEAD = IN_FEAT // N_HEAD  # 8


def _mha_kernel(k_ref, v_ref, q_ref,
                wkvq_ref, bkvq_ref, wf_ref, bf_ref,
                out_ref, attn_ref):
    tb, lk, d = k_ref.shape          # batch-block size, key length, feature dim
    lq = q_ref.shape[1]
    n_kv = tb * lk
    n_q = tb * lq

    # ---- Fused K/V/Q projection: one MXU dispatch, one bias add. ----
    # Row-stack the three inputs (sublane concat; each piece is vreg-aligned)
    # and multiply by the lane-concatenated weight [wk | wv | wq] (32, 96).
    x = jnp.concatenate(
        [k_ref[...].reshape(n_kv, d),
         v_ref[...].reshape(n_kv, d),
         q_ref[...].reshape(n_q, d)], axis=0)               # (2*n_kv + n_q, 32)
    y = jnp.dot(x, wkvq_ref[...], preferred_element_type=jnp.float32) + bkvq_ref[...]

    # Read each projection back from its own 32-lane band (exact same math as
    # three separate (N,32)@(32,32) matmuls).
    k3 = y[:n_kv, 0:d].reshape(tb, lk, d)                              # K proj
    v3 = y[n_kv:2 * n_kv, d:2 * d].reshape(tb, lk, d)                  # V proj
    q3 = (y[2 * n_kv:, 2 * d:3 * d]
          * (1.0 / math.sqrt(PER_HEAD))).reshape(tb, lq, d)            # Q proj, pre-scaled

    # Batched (over the block) per-head contractions.
    dn_qk = (((2,), (2,)), ((0,), (0,)))   # q_h @ k_h^T, batch over block dim
    dn_av = (((2,), (1,)), ((0,), (0,)))   # attn @ v_h, batch over block dim

    out_acc = None
    for h in range(N_HEAD):                # static loop over heads
        lo = h * PER_HEAD
        hi = lo + PER_HEAD
        qh = q3[:, :, lo:hi]               # (tb, lq, 8)  -- sliced once per head
        kh = k3[:, :, lo:hi]               # (tb, lk, 8)
        vh = v3[:, :, lo:hi]               # (tb, lk, 8)

        s = lax.dot_general(qh, kh, dn_qk,
                            preferred_element_type=jnp.float32)        # (tb, lq, lk)
        s = s - jnp.max(s, axis=-1, keepdims=True)
        p = jnp.exp(s)
        attn = p * (1.0 / jnp.sum(p, axis=-1, keepdims=True))          # softmax (exact recip)
        if h == 0:
            # fin_attn = atten_weight[:, 0, :, :] (pre-dropout softmax, head 0):
            # one contiguous slab store per grid step.
            attn_ref[...] = attn.astype(attn_ref.dtype)
        # TODO(synk): nn.Dropout(0.1) is identity in eval mode; training-mode RNG drop not emitted.

        ctx = lax.dot_general(attn, vh, dn_av,
                              preferred_element_type=jnp.float32)      # (tb, lq, 8)
        # Fold the final linear into the head loop: avoids the lane-direction
        # concatenate of per-head context slabs (MXU has plenty of slack).
        partial = jnp.dot(ctx.reshape(n_q, PER_HEAD), wf_ref[lo:hi, :],
                          preferred_element_type=jnp.float32)          # (n_q, 32)
        out_acc = partial if out_acc is None else out_acc + partial

    out = out_acc + bf_ref[...]                                        # bias once
    out_ref[...] = out.reshape(tb, lq, d).astype(out_ref.dtype)


def multi_headed_attention(key, value, query, params, num_batch_blocks=1):
    """Pallas forward. key/value: (B, Lk, D); query: (B, Lq, D).

    num_batch_blocks=1 by default (single-TC v5e/v6e: extra grid steps are pure
    overhead). On v7x it may be set to 2 to shard the batch across both
    TensorCores; sweep {1,2} under xprof.
    """
    bs, lk, d = key.shape
    lq = query.shape[1]
    assert d == IN_FEAT
    assert value.shape == key.shape
    assert bs % num_batch_blocks == 0
    tb = bs // num_batch_blocks

    # Lane-concatenated projection weight [wk | wv | wq] and bias [bk | bv | bq]:
    # lets the kernel do all three projections in one MXU dispatch. Built once
    # in the wrapper (tiny, weight-shaped, not input-shaped).
    w_kvq = jnp.concatenate([params["wk"], params["wv"], params["wq"]], axis=1)   # (32, 96)
    b_kvq = jnp.concatenate([params["bk"], params["bv"], params["bq"]]).reshape(1, 3 * d)
    bf = params["bf"].reshape(1, d)

    kv_spec = pl.BlockSpec((tb, lk, d), lambda b: (b, 0, 0))
    q_spec = pl.BlockSpec((tb, lq, d), lambda b: (b, 0, 0))
    # Constant index_maps -> Pallas keeps weights/biases VMEM-resident across steps.
    wkvq_spec = pl.BlockSpec((d, 3 * d), lambda b: (0, 0))
    bkvq_spec = pl.BlockSpec((1, 3 * d), lambda b: (0, 0))
    wf_spec = pl.BlockSpec((d, d), lambda b: (0, 0))
    bf_spec = pl.BlockSpec((1, d), lambda b: (0, 0))

    out_shape = (jax.ShapeDtypeStruct((bs, lq, d), jnp.float32),
                 jax.ShapeDtypeStruct((bs, lq, lk), jnp.float32))
    out_specs = (pl.BlockSpec((tb, lq, d), lambda b: (b, 0, 0)),
                 pl.BlockSpec((tb, lq, lk), lambda b: (b, 0, 0)))

    return pl.pallas_call(
        _mha_kernel,
        out_shape=out_shape,
        grid=(num_batch_blocks,),
        in_specs=[kv_spec, kv_spec, q_spec,
                  wkvq_spec, bkvq_spec, wf_spec, bf_spec],
        out_specs=out_specs,
        compiler_params=pltpu.CompilerParams(dimension_semantics=("parallel",)),
    )(key, value, query, w_kvq, b_kvq, params["wf"], bf)


def _ref_forward(key, value, query, p):
    """Pure-JAX reference mirroring the PyTorch forward (eval mode)."""
    k = key @ p["wk"] + p["bk"]
    v = value @ p["wv"] + p["bv"]
    q = query @ p["wq"] + p["bq"]
    bs, lq, d = q.shape

    def split(x):
        return x.reshape(bs, x.shape[1], N_HEAD, PER_HEAD).transpose(0, 2, 1, 3)

    qh = split(q) / math.sqrt(PER_HEAD)
    kh, vh = split(k), split(v)
    scores = jnp.einsum("bhqd,bhkd->bhqk", qh, kh)
    attn = jax.nn.softmax(scores, axis=-1)
    ctx = jnp.einsum("bhqk,bhkd->bhqd", attn, vh)
    ctx = ctx.transpose(0, 2, 1, 3).reshape(bs, lq, d)
    out = ctx @ p["wf"] + p["bf"]
    return out, attn[:, 0]


def _init_params(rng):
    """Deterministic nn.Linear-shaped params; stored as (in, out) so y = x@W+b."""
    keys = jax.random.split(rng, 8)
    bound = 1.0 / math.sqrt(IN_FEAT)
    u = lambda k, shape: jax.random.uniform(k, shape, jnp.float32, -bound, bound)
    return {
        "wk": u(keys[0], (IN_FEAT, IN_FEAT)), "bk": u(keys[1], (IN_FEAT,)),
        "wv": u(keys[2], (IN_FEAT, IN_FEAT)), "bv": u(keys[3], (IN_FEAT,)),
        "wq": u(keys[4], (IN_FEAT, IN_FEAT)), "bq": u(keys[5], (IN_FEAT,)),
        "wf": u(keys[6], (IN_FEAT, IN_FEAT)), "bf": u(keys[7], (IN_FEAT,)),
    }


if __name__ == "__main__":
    rng = jax.random.PRNGKey(0)
    r_p, r_k, r_v, r_q = jax.random.split(rng, 4)

    bs, seq = 4, 8          # single grid step over the whole batch by default
    params = _init_params(r_p)
    key = jax.random.normal(r_k, (bs, seq, IN_FEAT), jnp.float32)
    value = jax.random.normal(r_v, (bs, seq, IN_FEAT), jnp.float32)
    query = jax.random.normal(r_q, (bs, seq, IN_FEAT), jnp.float32)

    out, fin_attn = multi_headed_attention(key, value, query, params)
    jax.block_until_ready((out, fin_attn))

    ref_out, ref_attn = _ref_forward(key, value, query, params)
    np.testing.assert_allclose(np.asarray(out), np.asarray(ref_out), rtol=1e-5, atol=1e-5)
    np.testing.assert_allclose(np.asarray(fin_attn), np.asarray(ref_attn), rtol=1e-5, atol=1e-5)

    print("KERNEL_OK")
</pallas_src>

<mosaic_0001>
module attributes {stable_mosaic.version = 11 : i64} {
  func.func @_mha_kernel(%arg0: i32, %arg1: memref<4x8x32xf32, #tpu.memory_space<vmem>>, %arg2: memref<4x8x32xf32, #tpu.memory_space<vmem>>, %arg3: memref<4x8x32xf32, #tpu.memory_space<vmem>>, %arg4: memref<32x96xf32, #tpu.memory_space<vmem>>, %arg5: memref<1x96xf32, #tpu.memory_space<vmem>>, %arg6: memref<32x32xf32, #tpu.memory_space<vmem>>, %arg7: memref<1x32xf32, #tpu.memory_space<vmem>>, %arg8: memref<4x8x32xf32, #tpu.memory_space<vmem>>, %arg9: memref<4x8x8xf32, #tpu.memory_space<vmem>>) attributes {dimension_semantics = [#tpu.dimension_semantics<parallel>], iteration_bounds = array<i64: 1>, scalar_prefetch = 0 : i64, scratch_operands = 0 : i64, tpu.core_type = #tpu.core_type<tc>, window_params = [{transform_indices = @transform_0, window_bounds = array<i64: 4, 8, 32>}, {transform_indices = @transform_1, window_bounds = array<i64: 4, 8, 32>}, {transform_indices = @transform_2, window_bounds = array<i64: 4, 8, 32>}, {pipeline_mode = #tpu.pipeline_mode<synchronous>, transform_indices = @transform_3, window_bounds = array<i64: 32, 96>}, {pipeline_mode = #tpu.pipeline_mode<synchronous>, transform_indices = @transform_4, window_bounds = array<i64: 1, 96>}, {pipeline_mode = #tpu.pipeline_mode<synchronous>, transform_indices = @transform_5, window_bounds = array<i64: 32, 32>}, {pipeline_mode = #tpu.pipeline_mode<synchronous>, transform_indices = @transform_6, window_bounds = array<i64: 1, 32>}, {transform_indices = @transform_7, window_bounds = array<i64: 4, 8, 32>}, {transform_indices = @transform_8, window_bounds = array<i64: 4, 8, 8>}]} {
    %c0 = arith.constant 0 : index
    %c0_0 = arith.constant 0 : index
    %c0_1 = arith.constant 0 : index
    %0 = vector.load %arg1[%c0, %c0_0, %c0_1] : memref<4x8x32xf32, #tpu.memory_space<vmem>>, vector<4x8x32xf32>
    %1 = vector.shape_cast %0 : vector<4x8x32xf32> to vector<32x32xf32>
    %c0_2 = arith.constant 0 : index
    %c0_3 = arith.constant 0 : index
    %c0_4 = arith.constant 0 : index
    %2 = vector.load %arg2[%c0_2, %c0_3, %c0_4] : memref<4x8x32xf32, #tpu.memory_space<vmem>>, vector<4x8x32xf32>
    %3 = vector.shape_cast %2 : vector<4x8x32xf32> to vector<32x32xf32>
    %c0_5 = arith.constant 0 : index
    %c0_6 = arith.constant 0 : index
    %c0_7 = arith.constant 0 : index
    %4 = vector.load %arg3[%c0_5, %c0_6, %c0_7] : memref<4x8x32xf32, #tpu.memory_space<vmem>>, vector<4x8x32xf32>
    %5 = vector.shape_cast %4 : vector<4x8x32xf32> to vector<32x32xf32>
    %6 = tpu.concatenate %1, %3, %5 in 0 : vector<32x32xf32>, vector<32x32xf32>, vector<32x32xf32> -> vector<96x32xf32>
    %c0_8 = arith.constant 0 : index
    %c0_9 = arith.constant 0 : index
    %7 = vector.load %arg4[%c0_8, %c0_9] : memref<32x96xf32, #tpu.memory_space<vmem>>, vector<32x96xf32>
    %cst = arith.constant dense<0.000000e+00> : vector<96x96xf32>
    %8 = tpu.matmul %6, %7, %cst {dimension_numbers = #tpu.dot_dimension_numbers<[1], [0], [0], [1], [0, 0, 1, 1], [], []>} : vector<96x32xf32>, vector<32x96xf32>, vector<96x96xf32> -> vector<96x96xf32>
    %c0_10 = arith.constant 0 : index
    %c0_11 = arith.constant 0 : index
    %9 = vector.load %arg5[%c0_10, %c0_11] : memref<1x96xf32, #tpu.memory_space<vmem>>, vector<1x96xf32>
    %10 = vector.broadcast %9 : vector<1x96xf32> to vector<96x96xf32>
    %11 = arith.addf %8, %10 : vector<96x96xf32>
    %12 = vector.extract_strided_slice %11 {offsets = [0, 0], sizes = [32, 32], strides = [1, 1]} : vector<96x96xf32> to vector<32x32xf32>
    %13 = vector.shape_cast %12 : vector<32x32xf32> to vector<4x8x32xf32>
    %14 = vector.extract_strided_slice %11 {offsets = [32, 32], sizes = [32, 32], strides = [1, 1]} : vector<96x96xf32> to vector<32x32xf32>
    %15 = vector.shape_cast %14 : vector<32x32xf32> to vector<4x8x32xf32>
    %16 = vector.extract_strided_slice %11 {offsets = [64, 64], sizes = [32, 32], strides = [1, 1]} : vector<96x96xf32> to vector<32x32xf32>
    %cst_12 = arith.constant 0.353553385 : f32
    %17 = vector.broadcast %cst_12 : f32 to vector<32x32xf32>
    %18 = arith.mulf %16, %17 : vector<32x32xf32>
    %19 = vector.shape_cast %18 : vector<32x32xf32> to vector<4x8x32xf32>
    %20 = vector.extract_strided_slice %19 {offsets = [0, 0, 0], sizes = [4, 8, 8], strides = [1, 1, 1]} : vector<4x8x32xf32> to vector<4x8x8xf32>
    %21 = vector.extract_strided_slice %13 {offsets = [0, 0, 0], sizes = [4, 8, 8], strides = [1, 1, 1]} : vector<4x8x32xf32> to vector<4x8x8xf32>
    %22 = vector.extract_strided_slice %15 {offsets = [0, 0, 0], sizes = [4, 8, 8], strides = [1, 1, 1]} : vector<4x8x32xf32> to vector<4x8x8xf32>
    %cst_13 = arith.constant dense<0.000000e+00> : vector<4x8x8xf32>
    %23 = tpu.matmul %20, %21, %cst_13 {dimension_numbers = #tpu.dot_dimension_numbers<[2], [2], [1], [1], [0, 0, 0, 1, 1, 1], [0], [0]>} : vector<4x8x8xf32>, vector<4x8x8xf32>, vector<4x8x8xf32> -> vector<4x8x8xf32>
    %cst_14 = arith.constant dense<0xFF800000> : vector<4x8xf32>
    %24 = vector.multi_reduction <maximumf>, %23, %cst_14 [2] : vector<4x8x8xf32> to vector<4x8xf32>
    %25 = vector.shape_cast %24 : vector<4x8xf32> to vector<4x8x1xf32>
    %26 = vector.broadcast %25 : vector<4x8x1xf32> to vector<4x8x8xf32>
    %27 = arith.subf %23, %26 : vector<4x8x8xf32>
    %28 = math.exp %27 : vector<4x8x8xf32>
    %cst_15 = arith.constant dense<0.000000e+00> : vector<4x8xf32>
    %29 = vector.multi_reduction <add>, %28, %cst_15 [2] : vector<4x8x8xf32> to vector<4x8xf32>
    %30 = vector.shape_cast %29 : vector<4x8xf32> to vector<4x8x1xf32>
    %cst_16 = arith.constant 1.000000e+00 : f32
    %31 = vector.broadcast %cst_16 : f32 to vector<4x8x1xf32>
    %32 = arith.divf %31, %30 : vector<4x8x1xf32>
    %33 = vector.broadcast %32 : vector<4x8x1xf32> to vector<4x8x8xf32>
    %34 = arith.mulf %28, %33 : vector<4x8x8xf32>
    %c0_17 = arith.constant 0 : index
    %c0_18 = arith.constant 0 : index
    %c0_19 = arith.constant 0 : index
    %35 = vector.load %arg9[%c0_17, %c0_18, %c0_19] : memref<4x8x8xf32, #tpu.memory_space<vmem>>, vector<4x8x8xf32>
    tpu.vector_store %arg9[%c0_17, %c0_18, %c0_19], %34 {strides = array<i32>} : memref<4x8x8xf32, #tpu.memory_space<vmem>>, vector<4x8x8xf32>,
    %cst_20 = arith.constant dense<0.000000e+00> : vector<4x8x8xf32>
    %36 = tpu.matmul %34, %22, %cst_20 {dimension_numbers = #tpu.dot_dimension_numbers<[2], [1], [1], [2], [0, 0, 0, 1, 1, 2], [0], [0]>} : vector<4x8x8xf32>, vector<4x8x8xf32>, vector<4x8x8xf32> -> vector<4x8x8xf32>
    %37 = vector.shape_cast %36 : vector<4x8x8xf32> to vector<32x8xf32>
    %c0_21 = arith.constant 0 : index
    %c0_22 = arith.constant 0 : index
    %38 = vector.load %arg6[%c0_21, %c0_22] : memref<32x32xf32, #tpu.memory_space<vmem>>, vector<8x32xf32>
    %cst_23 = arith.constant dense<0.000000e+00> : vector<32x32xf32>
    %39 = tpu.matmul %37, %38, %cst_23 {dimension_numbers = #tpu.dot_dimension_numbers<[1], [0], [0], [1], [0, 0, 1, 1], [], []>} : vector<32x8xf32>, vector<8x32xf32>, vector<32x32xf32> -> vector<32x32xf32>
    %40 = vector.extract_strided_slice %19 {offsets = [0, 0, 8], sizes = [4, 8, 8], strides = [1, 1, 1]} : vector<4x8x32xf32> to vector<4x8x8xf32>
    %41 = vector.extract_strided_slice %13 {offsets = [0, 0, 8], sizes = [4, 8, 8], strides = [1, 1, 1]} : vector<4x8x32xf32> to vector<4x8x8xf32>
    %42 = vector.extract_strided_slice %15 {offsets = [0, 0, 8], sizes = [4, 8, 8], strides = [1, 1, 1]} : vector<4x8x32xf32> to vector<4x8x8xf32>
    %cst_24 = arith.constant dense<0.000000e+00> : vector<4x8x8xf32>
    %43 = tpu.matmul %40, %41, %cst_24 {dimension_numbers = #tpu.dot_dimension_numbers<[2], [2], [1], [1], [0, 0, 0, 1, 1, 1], [0], [0]>} : vector<4x8x8xf32>, vector<4x8x8xf32>, vector<4x8x8xf32> -> vector<4x8x8xf32>
    %cst_25 = arith.constant dense<0xFF800000> : vector<4x8xf32>
    %44 = vector.multi_reduction <maximumf>, %43, %cst_25 [2] : vector<4x8x8xf32> to vector<4x8xf32>
    %45 = vector.shape_cast %44 : vector<4x8xf32> to vector<4x8x1xf32>
    %46 = vector.broadcast %45 : vector<4x8x1xf32> to vector<4x8x8xf32>
    %47 = arith.subf %43, %46 : vector<4x8x8xf32>
    %48 = math.exp %47 : vector<4x8x8xf32>
    %cst_26 = arith.constant dense<0.000000e+00> : vector<4x8xf32>
    %49 = vector.multi_reduction <add>, %48, %cst_26 [2] : vector<4x8x8xf32> to vector<4x8xf32>
    %50 = vector.shape_cast %49 : vector<4x8xf32> to vector<4x8x1xf32>
    %cst_27 = arith.constant 1.000000e+00 : f32
    %51 = vector.broadcast %cst_27 : f32 to vector<4x8x1xf32>
    %52 = arith.divf %51, %50 : vector<4x8x1xf32>
    %53 = vector.broadcast %52 : vector<4x8x1xf32> to vector<4x8x8xf32>
    %54 = arith.mulf %48, %53 : vector<4x8x8xf32>
    %cst_28 = arith.constant dense<0.000000e+00> : vector<4x8x8xf32>
    %55 = tpu.matmul %54, %42, %cst_28 {dimension_numbers = #tpu.dot_dimension_numbers<[2], [1], [1], [2], [0, 0, 0, 1, 1, 2], [0], [0]>} : vector<4x8x8xf32>, vector<4x8x8xf32>, vector<4x8x8xf32> -> vector<4x8x8xf32>
    %56 = vector.shape_cast %55 : vector<4x8x8xf32> to vector<32x8xf32>
    %c8 = arith.constant 8 : index
    %c0_29 = arith.constant 0 : index
    %57 = vector.load %arg6[%c8, %c0_29] : memref<32x32xf32, #tpu.memory_space<vmem>>, vector<8x32xf32>
    %cst_30 = arith.constant dense<0.000000e+00> : vector<32x32xf32>
    %58 = tpu.matmul %56, %57, %cst_30 {dimension_numbers = #tpu.dot_dimension_numbers<[1], [0], [0], [1], [0, 0, 1, 1], [], []>} : vector<32x8xf32>, vector<8x32xf32>, vector<32x32xf32> -> vector<32x32xf32>
    %59 = arith.addf %39, %58 : vector<32x32xf32>
    %60 = vector.extract_strided_slice %19 {offsets = [0, 0, 16], sizes = [4, 8, 8], strides = [1, 1, 1]} : vector<4x8x32xf32> to vector<4x8x8xf32>
    %61 = vector.extract_strided_slice %13 {offsets = [0, 0, 16], sizes = [4, 8, 8], strides = [1, 1, 1]} : vector<4x8x32xf32> to vector<4x8x8xf32>
    %62 = vector.extract_strided_slice %15 {offsets = [0, 0, 16], sizes = [4, 8, 8], strides = [1, 1, 1]} : vector<4x8x32xf32> to vector<4x8x8xf32>
    %cst_31 = arith.constant dense<0.000000e+00> : vector<4x8x8xf32>
    %63 = tpu.matmul %60, %61, %cst_31 {dimension_numbers = #tpu.dot_dimension_numbers<[2], [2], [1], [1], [0, 0, 0, 1, 1, 1], [0], [0]>} : vector<4x8x8xf32>, vector<4x8x8xf32>, vector<4x8x8xf32> -> vector<4x8x8xf32>
    %cst_32 = arith.constant dense<0xFF800000> : vector<4x8xf32>
    %64 = vector.multi_reduction <maximumf>, %63, %cst_32 [2] : vector<4x8x8xf32> to vector<4x8xf32>
    %65 = vector.shape_cast %64 : vector<4x8xf32> to vector<4x8x1xf32>
    %66 = vector.broadcast %65 : vector<4x8x1xf32> to vector<4x8x8xf32>
    %67 = arith.subf %63, %66 : vector<4x8x8xf32>
    %68 = math.exp %67 : vector<4x8x8xf32>
    %cst_33 = arith.constant dense<0.000000e+00> : vector<4x8xf32>
    %69 = vector.multi_reduction <add>, %68, %cst_33 [2] : vector<4x8x8xf32> to vector<4x8xf32>
    %70 = vector.shape_cast %69 : vector<4x8xf32> to vector<4x8x1xf32>
    %cst_34 = arith.constant 1.000000e+00 : f32
    %71 = vector.broadcast %cst_34 : f32 to vector<4x8x1xf32>
    %72 = arith.divf %71, %70 : vector<4x8x1xf32>
    %73 = vector.broadcast %72 : vector<4x8x1xf32> to vector<4x8x8xf32>
    %74 = arith.mulf %68, %73 : vector<4x8x8xf32>
    %cst_35 = arith.constant dense<0.000000e+00> : vector<4x8x8xf32>
    %75 = tpu.matmul %74, %62, %cst_35 {dimension_numbers = #tpu.dot_dimension_numbers<[2], [1], [1], [2], [0, 0, 0, 1, 1, 2], [0], [0]>} : vector<4x8x8xf32>, vector<4x8x8xf32>, vector<4x8x8xf32> -> vector<4x8x8xf32>
    %76 = vector.shape_cast %75 : vector<4x8x8xf32> to vector<32x8xf32>
    %c16 = arith.constant 16 : index
    %c0_36 = arith.constant 0 : index
    %77 = vector.load %arg6[%c16, %c0_36] : memref<32x32xf32, #tpu.memory_space<vmem>>, vector<8x32xf32>
    %cst_37 = arith.constant dense<0.000000e+00> : vector<32x32xf32>
    %78 = tpu.matmul %76, %77, %cst_37 {dimension_numbers = #tpu.dot_dimension_numbers<[1], [0], [0], [1], [0, 0, 1, 1], [], []>} : vector<32x8xf32>, vector<8x32xf32>, vector<32x32xf32> -> vector<32x32xf32>
    %79 = arith.addf %59, %78 : vector<32x32xf32>
    %80 = vector.extract_strided_slice %19 {offsets = [0, 0, 24], sizes = [4, 8, 8], strides = [1, 1, 1]} : vector<4x8x32xf32> to vector<4x8x8xf32>
    %81 = vector.extract_strided_slice %13 {offsets = [0, 0, 24], sizes = [4, 8, 8], strides = [1, 1, 1]} : vector<4x8x32xf32> to vector<4x8x8xf32>
    %82 = vector.extract_strided_slice %15 {offsets = [0, 0, 24], sizes = [4, 8, 8], strides = [1, 1, 1]} : vector<4x8x32xf32> to vector<4x8x8xf32>
    %cst_38 = arith.constant dense<0.000000e+00> : vector<4x8x8xf32>
    %83 = tpu.matmul %80, %81, %cst_38 {dimension_numbers = #tpu.dot_dimension_numbers<[2], [2], [1], [1], [0, 0, 0, 1, 1, 1], [0], [0]>} : vector<4x8x8xf32>, vector<4x8x8xf32>, vector<4x8x8xf32> -> vector<4x8x8xf32>
    %cst_39 = arith.constant dense<0xFF800000> : vector<4x8xf32>
    %84 = vector.multi_reduction <maximumf>, %83, %cst_39 [2] : vector<4x8x8xf32> to vector<4x8xf32>
    %85 = vector.shape_cast %84 : vector<4x8xf32> to vector<4x8x1xf32>
    %86 = vector.broadcast %85 : vector<4x8x1xf32> to vector<4x8x8xf32>
    %87 = arith.subf %83, %86 : vector<4x8x8xf32>
    %88 = math.exp %87 : vector<4x8x8xf32>
    %cst_40 = arith.constant dense<0.000000e+00> : vector<4x8xf32>
    %89 = vector.multi_reduction <add>, %88, %cst_40 [2] : vector<4x8x8xf32> to vector<4x8xf32>
    %90 = vector.shape_cast %89 : vector<4x8xf32> to vector<4x8x1xf32>
    %cst_41 = arith.constant 1.000000e+00 : f32
    %91 = vector.broadcast %cst_41 : f32 to vector<4x8x1xf32>
    %92 = arith.divf %91, %90 : vector<4x8x1xf32>
    %93 = vector.broadcast %92 : vector<4x8x1xf32> to vector<4x8x8xf32>
    %94 = arith.mulf %88, %93 : vector<4x8x8xf32>
    %cst_42 = arith.constant dense<0.000000e+00> : vector<4x8x8xf32>
    %95 = tpu.matmul %94, %82, %cst_42 {dimension_numbers = #tpu.dot_dimension_numbers<[2], [1], [1], [2], [0, 0, 0, 1, 1, 2], [0], [0]>} : vector<4x8x8xf32>, vector<4x8x8xf32>, vector<4x8x8xf32> -> vector<4x8x8xf32>
    %96 = vector.shape_cast %95 : vector<4x8x8xf32> to vector<32x8xf32>
    %c24 = arith.constant 24 : index
    %c0_43 = arith.constant 0 : index
    %97 = vector.load %arg6[%c24, %c0_43] : memref<32x32xf32, #tpu.memory_space<vmem>>, vector<8x32xf32>
    %cst_44 = arith.constant dense<0.000000e+00> : vector<32x32xf32>
    %98 = tpu.matmul %96, %97, %cst_44 {dimension_numbers = #tpu.dot_dimension_numbers<[1], [0], [0], [1], [0, 0, 1, 1], [], []>} : vector<32x8xf32>, vector<8x32xf32>, vector<32x32xf32> -> vector<32x32xf32>
    %99 = arith.addf %79, %98 : vector<32x32xf32>
    %c0_45 = arith.constant 0 : index
    %c0_46 = arith.constant 0 : index
    %100 = vector.load %arg7[%c0_45, %c0_46] : memref<1x32xf32, #tpu.memory_space<vmem>>, vector<1x32xf32>
    %101 = vector.broadcast %100 : vector<1x32xf32> to vector<32x32xf32>
    %102 = arith.addf %99, %101 : vector<32x32xf32>
    %103 = vector.shape_cast %102 : vector<32x32xf32> to vector<4x8x32xf32>
    %c0_47 = arith.constant 0 : index
    %c0_48 = arith.constant 0 : index
    %c0_49 = arith.constant 0 : index
    %104 = vector.load %arg8[%c0_47, %c0_48, %c0_49] : memref<4x8x32xf32, #tpu.memory_space<vmem>>, vector<4x8x32xf32>
    tpu.vector_store %arg8[%c0_47, %c0_48, %c0_49], %103 {strides = array<i32>} : memref<4x8x32xf32, #tpu.memory_space<vmem>>, vector<4x8x32xf32>,
    return
  }
  func.func @transform_0(%arg0: i32) -> (i32, i32, i32) {
    %c0_i32 = arith.constant 0 : i32
    %c0_i32_0 = arith.constant 0 : i32
    %c0_i32_1 = arith.constant 0 : i32
    return %arg0, %c0_i32, %c0_i32_0 : i32, i32, i32
  }
  func.func @transform_1(%arg0: i32) -> (i32, i32, i32) {
    %c0_i32 = arith.constant 0 : i32
    %c0_i32_0 = arith.constant 0 : i32
    %c0_i32_1 = arith.constant 0 : i32
    return %arg0, %c0_i32, %c0_i32_0 : i32, i32, i32
  }
  func.func @transform_2(%arg0: i32) -> (i32, i32, i32) {
    %c0_i32 = arith.constant 0 : i32
    %c0_i32_0 = arith.constant 0 : i32
    %c0_i32_1 = arith.constant 0 : i32
    return %arg0, %c0_i32, %c0_i32_0 : i32, i32, i32
  }
  func.func @transform_3(%arg0: i32) -> (i32, i32) {
    %c0_i32 = arith.constant 0 : i32
    %c0_i32_0 = arith.constant 0 : i32
    %c0_i32_1 = arith.constant 0 : i32
    return %c0_i32, %c0_i32_0 : i32, i32
  }
  func.func @transform_4(%arg0: i32) -> (i32, i32) {
    %c0_i32 = arith.constant 0 : i32
    %c0_i32_0 = arith.constant 0 : i32
    %c0_i32_1 = arith.constant 0 : i32
    return %c0_i32, %c0_i32_0 : i32, i32
  }
  func.func @transform_5(%arg0: i32) -> (i32, i32) {
    %c0_i32 = arith.constant 0 : i32
    %c0_i32_0 = arith.constant 0 : i32
    %c0_i32_1 = arith.constant 0 : i32
    return %c0_i32, %c0_i32_0 : i32, i32
  }
  func.func @transform_6(%arg0: i32) -> (i32, i32) {
    %c0_i32 = arith.constant 0 : i32
    %c0_i32_0 = arith.constant 0 : i32
    %c0_i32_1 = arith.constant 0 : i32
    return %c0_i32, %c0_i32_0 : i32, i32
  }
  func.func @transform_7(%arg0: i32) -> (i32, i32, i32) {
    %c0_i32 = arith.constant 0 : i32
    %c0_i32_0 = arith.constant 0 : i32
    %c0_i32_1 = arith.constant 0 : i32
    return %arg0, %c0_i32, %c0_i32_0 : i32, i32, i32
  }
  func.func @transform_8(%arg0: i32) -> (i32, i32, i32) {
    %c0_i32 = arith.constant 0 : i32
    %c0_i32_0 = arith.constant 0 : i32
    %c0_i32_1 = arith.constant 0 : i32
    return %arg0, %c0_i32, %c0_i32_0 : i32, i32, i32
  }
}

</mosaic_0001>

<bundles_post_ra>
// kernel: tpu_custom_call.1
= control target key start
LH: loop header
LB: loop body
LE: loop exit
PB: predicated region body
PF: predicated region fallthrough
CT: control target
= control target key end

     0   :  { %14 = vsyncpa [#allocation3], 0  ;;  %s4598_s0 = inlined_call_operand.hbm [shape: f32[4,8,32], index: 0, kind: input, shape index: {}]   ;;  %s4599_s1 = inlined_call_operand.hbm [shape: f32[4,8,32], index: 1, kind: input, shape index: {}]   ;;  %s4600_s2 = inlined_call_operand.hbm [shape: f32[4,8,32], index: 2, kind: input, shape index: {}]   ;;  %s4601_s3 = inlined_call_operand.hbm [shape: f32[32,96], index: 3, kind: input, shape index: {}]   ;;  %s4602_s4 = inlined_call_operand.vmem [shape: f32[1,96], index: 4, kind: input, shape index: {}]   ;;  %s4603_s5 = inlined_call_operand.hbm [shape: f32[32,32], index: 5, kind: input, shape index: {}]   ;;  %s4604_s6 = inlined_call_operand.vmem [shape: f32[1,32], index: 6, kind: input, shape index: {}]   ;;  %s4605_s7 = inlined_call_operand.hbm [shape: f32[4,8,32], index: 7, kind: output, shape index: {0}]   ;;  %s4606_s8 = inlined_call_operand.hbm [shape: f32[4,8,8], index: 8, kind: output, shape index: {1}]  }
   0x1   :  { %15 = vsyncpa [#allocation6], 0 }
   0x2   :  { %16 = vsyncpa [#allocation9], 0 }
   0x3   :  { %17 = vsyncpa [#allocation4], 0 }
   0x4   :  { %18 = vsyncpa [#allocation13], 0  ;;  %s4068_s27 = smov [#allocation5]   ;;  %s4069_s29 = smov [#allocation8]  }
   0x5   :  { %s36_s28 = sshll.u32 %s4068_s27, 4  ;;  %s60_s30 = sshll.u32 %s4069_s29, 4  ;;  %s37_s28 = int_to_ptr.vmem [resolvable:$true] %s36_s28  ;;  %s4135_s30 = int_to_ptr.vmem [resolvable:$true] %s60_s30 }
   0x6   :  { %s3904_s11 = scalar_lea.hbm %s4599_s1, 512 }
   0x7   :  { %p3905_p0 = scmp.ne.s32.totalorder %s4599_s1, %s3904_s11  ;;  %p3908_p1 = scmp.lt.u32.totalorder %s3904_s11, %s4599_s1 }
   0x9   :  { %p3910_p2 = pnand %p3908_p1, %p3905_p0 }
   0xb   :  { %3913 = shalt.err (!%p3910_p2)
}
   0xc   :  { %s3914_s16 = scalar_lea.vmem %s37_s28, 512  ;;  %p3919_p4 = scmp.lt.s32.totalorder %s37_s28, %s37_s28 }
   0xd   :  { %p3915_p3 = scmp.ne.s32.totalorder %s37_s28, %s3914_s16  ;;  %p3920_p5 = scmp.lt.s32.totalorder %s3914_s16, %s3914_s16 }
   0xf   :  { %p3921_p6 = por %p3920_p5, %p3919_p4 }
  0x11   :  { %p3922_p7 = pnand %p3921_p6, %p3915_p3 }
  0x13   :  { %3925 = shalt.err (!%p3922_p7)
}
  0x14   :  { %s4070_s17 = smov 128   ;;  %s4071_s18 = smov 8  }
  0x15   :  { %42 = dma.hbm_to_vmem [thread:$0]  %s4599_s1, 512, %s37_s28, [#allocation6], %s4070_s17, %s4070_s17, %s4071_s18  }
  0x16   :  { %s3926_s23 = scalar_lea.hbm %s4601_s3, 512 }
  0x17   :  { %p3927_p8 = scmp.ne.s32.totalorder %s4601_s3, %s3926_s23  ;;  %p3930_p9 = scmp.lt.u32.totalorder %s3926_s23, %s4601_s3 }
  0x19   :  { %p3932_p10 = pnand %p3930_p9, %p3927_p8 }
  0x1b   :  { %3935 = shalt.err (!%p3932_p10)
}
  0x1c   :  { %s3936_s29 = scalar_lea.vmem %s4135_s30, 512  ;;  %p3941_p12 = scmp.lt.s32.totalorder %s4135_s30, %s4135_s30 }
  0x1d   :  { %p3937_p11 = scmp.ne.s32.totalorder %s4135_s30, %s3936_s29  ;;  %p3942_p13 = scmp.lt.s32.totalorder %s3936_s29, %s3936_s29 }
  0x1f   :  { %p3943_p0 = por %p3942_p13, %p3941_p12 }
  0x21   :  { %p3944_p1 = pnand %p3943_p0, %p3937_p11 }
  0x23   :  { %3947 = shalt.err (!%p3944_p1)
}
  0x24   :  { %66 = dma.hbm_to_vmem [thread:$0]  %s4601_s3, 512, %s4135_s30, [#allocation9], %s4070_s17, %s4070_s17, %s4071_s18  }
  0x25   :  { %s4072_s9 = smov [#allocation2]   ;;  %s4073_s11 = smov [#allocation7]  }
  0x26   :  { %s24_s10 = sshll.u32 %s4072_s9, 4  ;;  %s48_s12 = sshll.u32 %s4073_s11, 4  ;;  %s25_s10 = int_to_ptr.vmem [resolvable:$true] %s24_s10  ;;  %s4172_s12 = int_to_ptr.vmem [resolvable:$true] %s48_s12 }
  0x27   :  { %s3948_s15 = scalar_lea.hbm %s4598_s0, 512 }
  0x28   :  { %p3949_p2 = scmp.ne.s32.totalorder %s4598_s0, %s3948_s15  ;;  %p3952_p3 = scmp.lt.u32.totalorder %s3948_s15, %s4598_s0 }
  0x2a   :  { %p3954_p4 = pnand %p3952_p3, %p3949_p2 }
  0x2c   :  { %3957 = shalt.err (!%p3954_p4)
}
  0x2d   :  { %s3958_s3 = scalar_lea.vmem %s25_s10, 512  ;;  %p3963_p6 = scmp.lt.s32.totalorder %s25_s10, %s25_s10 }
  0x2e   :  { %p3959_p5 = scmp.ne.s32.totalorder %s25_s10, %s3958_s3  ;;  %p3964_p7 = scmp.lt.s32.totalorder %s3958_s3, %s3958_s3 }
  0x30   :  { %p3965_p8 = por %p3964_p7, %p3963_p6 }
  0x32   :  { %p3966_p9 = pnand %p3965_p8, %p3959_p5 }
  0x34   :  { %3969 = shalt.err (!%p3966_p9)
}
  0x35   :  { %30 = dma.hbm_to_vmem [thread:$0]  %s4598_s0, 512, %s25_s10, [#allocation3], %s4070_s17, %s4070_s17, %s4071_s18  }
  0x36   :  { %s3970_s25 = scalar_lea.hbm %s4600_s2, 512 }
  0x37   :  { %p3971_p10 = scmp.ne.s32.totalorder %s4600_s2, %s3970_s25  ;;  %p3974_p11 = scmp.lt.u32.totalorder %s3970_s25, %s4600_s2 }
  0x39   :  { %p3976_p12 = pnand %p3974_p11, %p3971_p10 }
  0x3b   :  { %3979 = shalt.err (!%p3976_p12)
}
  0x3c   :  { %s3980_s28 = scalar_lea.vmem %s4172_s12, 512  ;;  %p3985_p0 = scmp.lt.s32.totalorder %s4172_s12, %s4172_s12 }
  0x3d   :  { %p3981_p13 = scmp.ne.s32.totalorder %s4172_s12, %s3980_s28  ;;  %p3986_p1 = scmp.lt.s32.totalorder %s3980_s28, %s3980_s28 }
  0x3f   :  { %p3987_p2 = por %p3986_p1, %p3985_p0 }
  0x41   :  { %p3988_p3 = pnand %p3987_p2, %p3981_p13 }
  0x43   :  { %3991 = shalt.err (!%p3988_p3)
}
  0x44   :  { %54 = dma.hbm_to_vmem [thread:$0]  %s4600_s2, 512, %s4172_s12, [#allocation6], %s4070_s17, %s4070_s17, %s4071_s18  }
  0x45   :  { %s4074_s10 = smov [#allocation10]   ;;  %s3992_s15 = scalar_lea.hbm %s4603_s5, 512 }
  0x46   :  { %s74_s11 = sshll.u32 %s4074_s10, 4  ;;  %p3993_p4 = scmp.ne.s32.totalorder %s4603_s5, %s3992_s15  ;;  %s75_s11 = int_to_ptr.vmem [resolvable:$true] %s74_s11 }
  0x47   :  { %p3996_p5 = scmp.lt.u32.totalorder %s3992_s15, %s4603_s5 }
  0x49   :  { %p3998_p6 = pnand %p3996_p5, %p3993_p4 }
  0x4b   :  { %4001 = shalt.err (!%p3998_p6)
}
  0x4c   :  { %s4002_s3 = scalar_lea.vmem %s75_s11, 512  ;;  %p4007_p8 = scmp.lt.s32.totalorder %s75_s11, %s75_s11 }
  0x4d   :  { %p4003_p7 = scmp.ne.s32.totalorder %s75_s11, %s4002_s3  ;;  %p4008_p9 = scmp.lt.s32.totalorder %s4002_s3, %s4002_s3 }
  0x4f   :  { %p4009_p10 = por %p4008_p9, %p4007_p8 }
  0x51   :  { %p4010_p11 = pnand %p4009_p10, %p4003_p7 }
  0x53   :  { %4013 = shalt.err (!%p4010_p11)
}
  0x54   :  { %80 = dma.hbm_to_vmem [thread:$0]  %s4603_s5, 512, %s75_s11, [#allocation9], %s4070_s17, %s4070_s17, %s4071_s18  }
  0x55   :  { %4058 = dma.done.wait [#allocation3], 512  }
  0x56   :  { %4059 = vsyncadd [#allocation3], 4294966784 }
  0x57   :  { %4060 = dma.done.wait [#allocation6], 1024  }
  0x58   :  { %4061 = vsyncadd [#allocation6], 4294966272 }
  0x59   :  { %4062 = dma.done.wait [#allocation9], 1024  }
  0x5a   :  { %4063 = vsyncadd [#allocation9], 4294966272  ;;  %vm121_vm0 = vcmask 261120   ;;  %v110_v0 = vld [vmem:[#allocation8] sm:$0xff]  ;;  %v111_v1 = vld [vmem:[#allocation8 + $0x8] sm:$0xff]  ;;  %v4075_v18 = vmov 0.0  }
  0x5b   :  { %v112_v2 = vld [vmem:[#allocation8 + $0x10] sm:$0xff]  ;;  %v3798_v3 = vpack.c.bf16 %v111_v1, %v110_v0  ;;  %v113_v4 = vld [vmem:[#allocation8 + $0x18] sm:$0xff]  ;;  %v98_v5 = vld [vmem:[#allocation2] sm:$0xff]  ;;  %3606 = vmatprep.subr.mxu1 %v4075_v18  ;;  %vm4076_vm1 = vmmov 0   ;;  %vm290_vm2 = vcmask 64512   ;;  %s4078_s22 = smov 120  }
  0x5c   :  { %v3802_v6 = vpack.c.bf16 %v113_v4, %v112_v2  ;;  %3588 = vmatprep.mubr.msk.f32.mxu0 %vm121_vm0, %v98_v5  ;;  %v99_v7 = vld [vmem:[#allocation2 + $0x8] sm:$0xff]  ;;  %v100_v8 = vld [vmem:[#allocation2 + $0x10] sm:$0xff]  ;;  %v101_v9 = vld [vmem:[#allocation2 + $0x18] sm:$0xff]  ;;  %3608 = vmatprep.mubr.msk.f32.mxu1 %vm4076_vm1, %v4075_v18  ;;  %s4079_s23 = smov 96   ;;  %s4080_s24 = smov 56  }
  0x5d   :  { %3799 = vmatprep.subr.bf16.mxu0 %v3798_v3  ;;  %v102_v10 = vld [vmem:[#allocation5] sm:$0xff]  ;;  %v103_v11 = vld [vmem:[#allocation5 + $0x8] sm:$0xff]  ;;  %v104_v12 = vld [vmem:[#allocation5 + $0x10] sm:$0xff]  ;;  %s4081_s25 = smov 88   ;;  %s4082_s26 = smov 112  }
  0x5e   :  { %3801 = vmatpush3.bf16.msra.mxu0 %v3798_v3  ;;  %v105_v13 = vld [vmem:[#allocation5 + $0x18] sm:$0xff]  ;;  %v106_v14 = vld [vmem:[#allocation7] sm:$0xff]  ;;  %v107_v15 = vld [vmem:[#allocation7 + $0x8] sm:$0xff]  ;;  %s4083_s27 = smov 48   ;;  %s4084_s29 = smov 80  }
  0x5f   :  { %3803 = vmatprep.subr.bf16.mxu0 %v3802_v6  ;;  %v108_v16 = vld [vmem:[#allocation7 + $0x10] sm:$0xff]  ;;  %v109_v17 = vld [vmem:[#allocation7 + $0x18] sm:$0xff]  ;;  %v3402_v19 = vld [vmem:[%s4602_s4] ss:$0 sm:$0xff]  ;;  %s4077_s4 = smov 64   ;;  %s4085_s1 = smov 40  }
  0x60   :  { %s4086_s28 = smov 104   ;;  %s4087_s0 = smov 72  }
  0x61   :  { %s4088_s9 = smov [#allocation12]  }
  0x62   :  { %3805 = vmatpush3.bf16.msra.mxu0 %v3802_v6  ;;  %s3384_s10 = sshll.u32 %s4088_s9, 4  ;;  %s3385_s10 = int_to_ptr.vmem [resolvable:$true] %s3384_s10 }
  0x63   :  { %3641 = vmatprep.subr.mxu0 %v4075_v18  ;;  %s4014_s11 = scalar_lea.vmem %s3385_s10, 512  ;;  %p4019_p13 = scmp.lt.s32.totalorder %s3385_s10, %s3385_s10 }
  0x64   :  { %p4015_p12 = scmp.ne.s32.totalorder %s3385_s10, %s4014_s11  ;;  %p4020_p0 = scmp.lt.s32.totalorder %s4014_s11, %s4014_s11 }
  0x65   :  { %3589 = vmatmul.mubr.msk.f32.vlgmr.msra.gmra.mrb[0].mxu0 %vm121_vm0, %v99_v7 }
  0x66   :  { %3591 = vmatprep.mubr.msk.f32.mxu0 %vm121_vm0, %v100_v8  ;;  %p4021_p1 = por %p4020_p0, %p4019_p13 }
  0x68   :  { %p4022_p2 = pnand %p4021_p1, %p4015_p12 }
  0x69   :  { %3592 = vmatmul.mubr.msk.f32.gmra.mrb[2].mxu0 %vm121_vm0, %v101_v9 }
  0x6a   :  { %3594 = vmatprep.mubr.msk.f32.mxu0 %vm121_vm0, %v102_v10 }
  0x6d   :  { %3595 = vmatmul.mubr.msk.f32.gmra.mrb[4].mxu0 %vm121_vm0, %v103_v11 }
  0x6e   :  { %3597 = vmatprep.mubr.msk.f32.mxu0 %vm121_vm0, %v104_v12 }
  0x71   :  { %3598 = vmatmul.mubr.msk.f32.gmra.mrb[6].mxu0 %vm121_vm0, %v105_v13 }
  0x72   :  { %3600 = vmatprep.mubr.msk.f32.mxu0 %vm121_vm0, %v106_v14 }
  0x75   :  { %3601 = vmatmul.mubr.msk.f32.gmra.mrb[8].mxu0 %vm121_vm0, %v107_v15 }
  0x76   :  { %3603 = vmatprep.mubr.msk.f32.mxu0 %vm121_vm0, %v108_v16 }
  0x79   :  { %3604 = vmatmul.mubr.msk.f32.gmra.mrb[10].mxu0 %vm121_vm0, %v109_v17 }
  0x7a   :  { %3643 = vmatprep.mubr.msk.f32.mxu0 %vm4076_vm1, %v4075_v18 }
 0x138   :  { %v3590_v20 = vpop.f32.mrb[0].mxu0 }
 0x139   :  { %v224_v21 = vpop.f32.mrb[1].mxu0  ;;  %v4274_v47 = vadd.f32 %v3590_v20, %v3402_v19 }
 0x13a   :  { %v4245_v22 = vadd.f32 %v3402_v19, %v224_v21 }
 0x13c   :  { %v3593_v23 = vpop.f32.mrb[2].mxu0  ;;  %3607 = vmatpush3.xpose.msk.msra.mxu1 %vm290_vm2, %v4245_v22 }
 0x13d   :  { %v4249_v24 = vadd.f32 %v3593_v23, %v3402_v19  ;;  %v234_v25 = vpop.f32.mrb[3].mxu0  ;;  %3611 = vmatprep.subr.mxu1 %v4075_v18 }
 0x13e   :  { %v4252_v26 = vadd.f32 %v3402_v19, %v234_v25 }
 0x140   :  { %v3596_v27 = vpop.f32.mrb[4].mxu0 }
 0x141   :  { %v4254_v28 = vadd.f32 %v3596_v27, %v3402_v19  ;;  %v244_v29 = vpop.f32.mrb[5].mxu0 }
 0x142   :  { %v4256_v30 = vadd.f32 %v3402_v19, %v244_v29 }
 0x144   :  { %v3599_v31 = vpop.f32.mrb[6].mxu0 }
 0x145   :  { %v4258_v32 = vadd.f32 %v3599_v31, %v3402_v19  ;;  %v254_v33 = vpop.f32.mrb[7].mxu0 }
 0x146   :  { %v4260_v34 = vadd.f32 %v3402_v19, %v254_v33 }
 0x148   :  { %v3602_v35 = vpop.f32.mrb[8].mxu0 }
 0x149   :  { %v264_v36 = vpop.f32.mrb[9].mxu0  ;;  %v270_v38 = vadd.f32 %v3602_v35, %v3402_v19 }
 0x14a   :  { %v265_v37 = vadd.f32 %v3402_v19, %v264_v36 }
 0x14b   :  { %v4265_v44 = vmul.f32 0.35355338, %v270_v38 }
 0x14c   :  { %v4262_v39 = vmul.f32 0.35355338, %v265_v37  ;;  %v3605_v40 = vpop.f32.mrb[10].mxu0 }
 0x14d   :  { %v274_v41 = vpop.f32.mrb[11].mxu0  ;;  %v280_v42 = vadd.f32 %v3605_v40, %v3402_v19 }
 0x14e   :  { %v275_v43 = vadd.f32 %v3402_v19, %v274_v41  ;;  %288 = vrot.lane.b32.xlu0 %v4262_v39, %s4077_s4 }
 0x14f   :  { %v4269_v46 = vmul.f32 0.35355338, %v280_v42 }
 0x150   :  { %v4267_v45 = vmul.f32 0.35355338, %v275_v43 }
 0x152   :  { %445 = vrot.lane.b32.xlu1 %v4267_v45, %s4077_s4  ;;  %367 = vrot.lane.b32.xlu0 %v4265_v44, %s4077_s4 }
 0x156   :  { %523 = vrot.lane.b32.xlu1 %v4269_v46, %s4077_s4 }
 0x15a   :  { %1041 = vrot.lane.b32.xlu1 %v4274_v47, %s4078_s22 }
 0x1c0   :  { %v289_v48 = vpop.permute.xlu0 %288 }
 0x1c1   :  { %3609 = vmatmul.mubr.msk.f32.vlgmr.msra.gmra.mrb[0].mxu1 %vm290_vm2, %v289_v48 }
 0x1c2   :  { %3612 = vmatpush3.xpose.msk.msra.mxu1 %vm290_vm2, %v4274_v47  ;;  %3613 = vmatprep.mubr.msk.f32.mxu1 %vm4076_vm1, %v4075_v18 }
 0x1c3   :  { %3616 = vmatprep.subr.mxu1 %v4075_v18 }
 0x1c4   :  { %v368_v49 = vpop.permute.xlu0 %367  ;;  %v446_v50 = vpop.permute.xlu1 %445 }
 0x1c5   :  { %3614 = vmatmul.mubr.msk.f32.vlgmr.msra.gmra.mrb[2].mxu1 %vm290_vm2, %v368_v49 }
 0x1c6   :  { %3617 = vmatpush3.xpose.msk.msra.mxu1 %vm290_vm2, %v4252_v26  ;;  %3618 = vmatprep.mubr.msk.f32.mxu1 %vm4076_vm1, %v4075_v18 }
 0x1c7   :  { %3621 = vmatprep.subr.mxu1 %v4075_v18 }
 0x1c8   :  { %v524_v51 = vpop.permute.xlu1 %523 }
 0x1c9   :  { %3619 = vmatmul.mubr.msk.f32.vlgmr.msra.gmra.mrb[4].mxu1 %vm290_vm2, %v446_v50 }
 0x1ca   :  { %3622 = vmatpush3.xpose.msk.msra.mxu1 %vm290_vm2, %v4249_v24  ;;  %3623 = vmatprep.mubr.msk.f32.mxu1 %vm4076_vm1, %v4075_v18 }
 0x1cb   :  { %3626 = vmatprep.subr.mxu1 %v4075_v18 }
 0x1cc   :  { %v1042_v13 = vpop.permute.xlu1 %1041 }
 0x1cd   :  { %3624 = vmatmul.mubr.msk.f32.vlgmr.msra.gmra.mrb[6].mxu1 %vm290_vm2, %v524_v51 }
 0x1ce   :  { %3628 = vmatprep.mubr.msk.f32.mxu1 %vm4076_vm1, %v4075_v18 }
 0x294   :  { %v4299_v52 = vpop.f32.mrb[0].mxu1 }
 0x295   :  { %v3610_v53 = vpop.f32.mrb[1].mxu1  ;;  %v600_v10 = vsel %vm290_vm2, %v4299_v52, -inf }
 0x298   :  { %v440_v54 = vpop.f32.mrb[2].mxu1 }
 0x299   :  { %v3615_v55 = vpop.f32.mrb[3].mxu1  ;;  %v603_v61 = vsel %vm290_vm2, %v440_v54, -inf }
 0x29c   :  { %v518_v56 = vpop.f32.mrb[4].mxu1 }
 0x29d   :  { %v3620_v57 = vpop.f32.mrb[5].mxu1  ;;  %v606_v62 = vsel %vm290_vm2, %v518_v56, -inf }
 0x2a0   :  { %v596_v58 = vpop.f32.mrb[6].mxu1 }
 0x2a1   :  { %v3625_v59 = vpop.f32.mrb[7].mxu1  ;;  %v609_v60 = vsel %vm290_vm2, %v596_v58, -inf }
 0x2a2   :  { %610 = vmax.xlane.f32.xlu0 %v609_v60 }
 0x2b8   :  { %884 = vrot.lane.b32.xlu0 %v4258_v32, %s4079_s23 }
 0x2bc   :  { %1039 = vrot.lane.b32.xlu0 %v4265_v44, %s4080_s24 }
 0x2c0   :  { %1195 = vrot.lane.b32.xlu0 %v4269_v46, %s4080_s24 }
 0x2df   :  { %604 = vmax.xlane.f32.xlu0 %v603_v61 }
 0x2e3   :  { %607 = vmax.xlane.f32.xlu0 %v606_v62 }
 0x32f   :  { %v611_v63 = vpop.xlane.xlu0 %610 }
 0x330   :  { %v615_v0 = vsub.f32 %v596_v58, %v611_v63 }
 0x332   :  { %v622_v1 = vmul.f32 1.442695, %v615_v0 }
 0x333   :  { %v885_v2 = vpop.permute.xlu0 %884 }
 0x334   :  { %3840 = vpow2.f32 %v622_v1  ;;  %3642 = vmatpush3.msra.mxu0 %v885_v2 }
 0x335   :  { %3651 = vmatprep.subr.mxu0 %v4075_v18 }
 0x337   :  { %v1040_v5 = vpop.permute.xlu0 %1039 }
 0x33b   :  { %v1196_v6 = vpop.permute.xlu0 %1195 }
 0x33e   :  { %v3841_v3 = vpop.eup %3840 }
 0x33f   :  { %v633_v4 = vsel %vm290_vm2, %v3841_v3, 0.0 }
 0x340   :  { %634 = vadd.xlane.f32.xlu1 %v633_v4 }
 0x351   :  { %1197 = vrot.lane.b32.xlu1 %v4249_v24, %s4078_s22 }
 0x36c   :  { %v605_v7 = vpop.xlane.xlu0 %604 }
 0x36d   :  { %v613_v8 = vsub.f32 %v440_v54, %v605_v7 }
 0x36f   :  { %v618_v9 = vmul.f32 1.442695, %v613_v8 }
 0x370   :  { %v608_v19 = vpop.xlane.xlu0 %607 }
 0x371   :  { %3842 = vpow2.f32 %v618_v9  ;;  %v614_v20 = vsub.f32 %v518_v56, %v608_v19 }
 0x373   :  { %v620_v25 = vmul.f32 1.442695, %v614_v20 }
 0x375   :  { %601 = vmax.xlane.f32.xlu1 %v600_v10 }
 0x37b   :  { %v3843_v11 = vpop.eup %3842 }
 0x37c   :  { %v627_v12 = vsel %vm290_vm2, %v3843_v11, 0.0 }
 0x37d   :  { %628 = vadd.xlane.f32.xlu0 %v627_v12 }
 0x393   :  { %653 = vrot.lane.b32.xlu0 %v4256_v30, %s4079_s23 }
 0x397   :  { %963 = vrot.lane.b32.xlu0 %v4245_v22, %s4078_s22 }
 0x39b   :  { %1119 = vrot.lane.b32.xlu0 %v4252_v26, %s4078_s22 }
 0x3cd   :  { %v635_v14 = vpop.xlane.xlu1 %634 }
 0x3ce   :  { %3844 = vrcp.f32 %v635_v14 }
 0x3d1   :  { %v1198_v17 = vpop.permute.xlu1 %1197 }
 0x3d8   :  { %v3845_v15 = vpop.eup %3844 }
 0x3d9   :  { %v647_v16 = vmul.f32 %v3845_v15, %v3841_v3 }
 0x3db   :  { %651 = vst.msk [vmem:[#allocation12 + $0x18] sm:$0xff] %vm290_vm2, %v647_v16  ;;  %3644 = vmatmul.mubr.msk.f32.vlgmr.msra.gmra.mrb[12].mxu0 %vm290_vm2, %v647_v16 }
 0x3dc   :  { %3652 = vmatpush3.xpose.msk.msra.mxu0 %vm290_vm2, %v1042_v13  ;;  %3653 = vmatprep.mubr.msk.f32.mxu0 %vm4076_vm1, %v4075_v18 }
 0x3dd   :  { %3661 = vmatprep.subr.mxu0 %v4075_v18 }
 0x3df   :  { %3654 = vmatmul.mubr.msk.f32.vlgmr.msra.gmra.mrb[14].mxu0 %vm290_vm2, %v1040_v5 }
 0x3e0   :  { %3662 = vmatpush3.xpose.msk.msra.mxu0 %vm290_vm2, %v1198_v17  ;;  %3663 = vmatprep.mubr.msk.f32.mxu0 %vm4076_vm1, %v4075_v18 }
 0x3e1   :  { %3671 = vmatprep.subr.mxu0 %v4075_v18 }
 0x3e3   :  { %3664 = vmatmul.mubr.msk.f32.vlgmr.msra.gmra.mrb[16].mxu0 %vm290_vm2, %v1196_v6 }
 0x3e4   :  { %3673 = vmatprep.mubr.msk.f32.mxu0 %vm4076_vm1, %v4075_v18 }
 0x402   :  { %v602_v21 = vpop.xlane.xlu1 %601 }
 0x403   :  { %v612_v23 = vsub.f32 %v4299_v52, %v602_v21 }
 0x405   :  { %v616_v27 = vmul.f32 1.442695, %v612_v23 }
 0x407   :  { %3846 = vpow2.f32 %v616_v27 }
 0x408   :  { %3848 = vpow2.f32 %v620_v25 }
 0x40a   :  { %v629_v29 = vpop.xlane.xlu0 %628 }
 0x40b   :  { %3850 = vrcp.f32 %v629_v29 }
 0x40e   :  { %v654_v31 = vpop.permute.xlu0 %653 }
 0x40f   :  { %3627 = vmatpush3.msra.mxu1 %v654_v31 }
 0x410   :  { %3631 = vmatprep.subr.mxu1 %v4075_v18 }
 0x411   :  { %v3847_v33 = vpop.eup %3846 }
 0x412   :  { %v624_v35 = vsel %vm290_vm2, %v3847_v33, 0.0  ;;  %v3849_v36 = vpop.eup %3848  ;;  %v964_v59 = vpop.permute.xlu0 %963 }
 0x413   :  { %625 = vadd.xlane.f32.xlu1 %v624_v35  ;;  %v630_v40 = vsel %vm290_vm2, %v3849_v36, 0.0 }
 0x415   :  { %v3851_v37 = vpop.eup %3850 }
 0x416   :  { %v645_v38 = vmul.f32 %v3851_v37, %v3843_v11  ;;  %v1120_v63 = vpop.permute.xlu0 %1119 }
 0x417   :  { %631 = vadd.xlane.f32.xlu1 %v630_v40 }
 0x418   :  { %649 = vst.msk [vmem:[#allocation12 + $0x8] sm:$0xff] %vm290_vm2, %v645_v38 }
 0x428   :  { %730 = vrot.lane.b32.xlu1 %v4254_v28, %s4079_s23 }
 0x42c   :  { %807 = vrot.lane.b32.xlu1 %v4260_v34, %s4079_s23 }
 0x430   :  { %961 = vrot.lane.b32.xlu1 %v4262_v39, %s4080_s24 }
 0x434   :  { %1117 = vrot.lane.b32.xlu1 %v4267_v45, %s4080_s24 }
 0x4a0   :  { %v626_v41 = vpop.xlane.xlu1 %625 }
 0x4a1   :  { %3852 = vrcp.f32 %v626_v41 }
 0x4a4   :  { %v632_v42 = vpop.xlane.xlu1 %631 }
 0x4a5   :  { %3854 = vrcp.f32 %v632_v42 }
 0x4a8   :  { %v731_v49 = vpop.permute.xlu1 %730 }
 0x4ab   :  { %v3853_v43 = vpop.eup %3852 }
 0x4ac   :  { %v644_v48 = vmul.f32 %v3853_v43, %v3847_v33  ;;  %v808_v54 = vpop.permute.xlu1 %807 }
 0x4ae   :  { %648 = vst.msk [vmem:[#allocation12] sm:$0xff] %vm290_vm2, %v644_v48  ;;  %3629 = vmatmul.mubr.msk.f32.vlgmr.msra.gmra.mrb[8].mxu1 %vm290_vm2, %v644_v48  ;;  %v4352_v50 = vpop.f32.mrb[12].mxu0 }
 0x4af   :  { %v3855_v51 = vpop.eup %3854  ;;  %3632 = vmatpush3.msra.mxu1 %v731_v49  ;;  %v3645_v52 = vpop.f32.mrb[13].mxu0  ;;  %3633 = vmatprep.mubr.msk.f32.mxu1 %vm4076_vm1, %v4075_v18 }
 0x4b0   :  { %v646_v53 = vmul.f32 %v3855_v51, %v3849_v36  ;;  %3636 = vmatprep.subr.mxu1 %v4075_v18  ;;  %v962_v62 = vpop.permute.xlu1 %961 }
 0x4b2   :  { %650 = vst.msk [vmem:[#allocation12 + $0x10] sm:$0xff] %vm290_vm2, %v646_v53  ;;  %3634 = vmatmul.mubr.msk.f32.vlgmr.msra.gmra.mrb[10].mxu1 %vm290_vm2, %v645_v38  ;;  %v1113_v55 = vpop.f32.mrb[14].mxu0 }
 0x4b3   :  { %3637 = vmatpush3.msra.mxu1 %v808_v54  ;;  %v3655_v56 = vpop.f32.mrb[15].mxu0  ;;  %v1276_v57 = vsel %vm290_vm2, %v1113_v55, -inf  ;;  %3638 = vmatprep.mubr.msk.f32.mxu1 %vm4076_vm1, %v4075_v18 }
 0x4b4   :  { %1277 = vmax.xlane.f32.xlu0 %v1276_v57  ;;  %3646 = vmatprep.subr.mxu1 %v4075_v18  ;;  %v1118_v0 = vpop.permute.xlu1 %1117 }
 0x4b6   :  { %3639 = vmatmul.mubr.msk.f32.vlgmr.msra.gmra.mrb[12].mxu1 %vm290_vm2, %v646_v53  ;;  %v1269_v58 = vpop.f32.mrb[16].mxu0 }
 0x4b7   :  { %v3665_v60 = vpop.f32.mrb[17].mxu0  ;;  %v1282_v61 = vsel %vm290_vm2, %v1269_v58, -inf  ;;  %3648 = vmatprep.mubr.msk.f32.mxu1 %vm4076_vm1, %v4075_v18 }
 0x4b8   :  { %1283 = vmax.xlane.f32.xlu1 %v1282_v61 }
 0x4ba   :  { %3647 = vmatpush3.xpose.msk.msra.mxu1 %vm290_vm2, %v964_v59 }
 0x4bb   :  { %3656 = vmatprep.subr.mxu1 %v4075_v18 }
 0x4bd   :  { %3649 = vmatmul.mubr.msk.f32.vlgmr.msra.gmra.mrb[14].mxu1 %vm290_vm2, %v962_v62 }
 0x4be   :  { %3657 = vmatpush3.xpose.msk.msra.mxu1 %vm290_vm2, %v1120_v63  ;;  %3658 = vmatprep.mubr.msk.f32.mxu1 %vm4076_vm1, %v4075_v18 }
 0x4bf   :  { %3666 = vmatprep.subr.mxu1 %v4075_v18 }
 0x4c1   :  { %3659 = vmatmul.mubr.msk.f32.vlgmr.msra.gmra.mrb[16].mxu1 %vm290_vm2, %v1118_v0 }
 0x4c2   :  { %3668 = vmatprep.mubr.msk.f32.mxu1 %vm4076_vm1, %v4075_v18 }
 0x4c9   :  { %1397 = vrot.lane.b32.xlu1 %v4254_v28, %s4081_s25 }
 0x4cd   :  { %1822 = vrot.lane.b32.xlu1 %v4245_v22, %s4082_s26 }
 0x4d1   :  { %1820 = vrot.lane.b32.xlu1 %v4262_v39, %s4083_s27 }
 0x4d5   :  { %1898 = vrot.lane.b32.xlu1 %v4265_v44, %s4083_s27 }
 0x4d9   :  { %1976 = vrot.lane.b32.xlu1 %v4267_v45, %s4083_s27 }
 0x4dd   :  { %2054 = vrot.lane.b32.xlu1 %v4269_v46, %s4083_s27 }
 0x541   :  { %v1278_v1 = vpop.xlane.xlu0 %1277 }
 0x542   :  { %v1286_v2 = vsub.f32 %v1113_v55, %v1278_v1 }
 0x544   :  { %v1291_v3 = vmul.f32 1.442695, %v1286_v2 }
 0x545   :  { %v1284_v4 = vpop.xlane.xlu1 %1283 }
 0x546   :  { %3856 = vpow2.f32 %v1291_v3  ;;  %v1288_v5 = vsub.f32 %v1269_v58, %v1284_v4 }
 0x548   :  { %v1295_v6 = vmul.f32 1.442695, %v1288_v5 }
 0x549   :  { %v1398_v7 = vpop.permute.xlu1 %1397 }
 0x54a   :  { %3858 = vpow2.f32 %v1295_v6  ;;  %3672 = vmatpush3.msra.mxu0 %v1398_v7 }
 0x54b   :  { %3681 = vmatprep.subr.mxu0 %v4075_v18 }
 0x54d   :  { %v1823_v35 = vpop.permute.xlu1 %1822 }
 0x550   :  { %v3857_v8 = vpop.eup %3856 }
 0x551   :  { %v1300_v9 = vsel %vm290_vm2, %v3857_v8, 0.0  ;;  %v1821_v41 = vpop.permute.xlu1 %1820 }
 0x552   :  { %1301 = vadd.xlane.f32.xlu0 %v1300_v9 }
 0x554   :  { %v3859_v10 = vpop.eup %3858 }
 0x555   :  { %v1306_v11 = vsel %vm290_vm2, %v3859_v10, 0.0  ;;  %v1899_v43 = vpop.permute.xlu1 %1898 }
 0x556   :  { %1307 = vadd.xlane.f32.xlu0 %v1306_v11 }
 0x559   :  { %v1977_v49 = vpop.permute.xlu1 %1976 }
 0x55d   :  { %v2055_v52 = vpop.permute.xlu1 %2054 }
 0x56c   :  { %1549 = vrot.lane.b32.xlu0 %v4258_v32, %s4081_s25 }
 0x570   :  { %1900 = vrot.lane.b32.xlu0 %v4274_v47, %s4082_s26 }
 0x574   :  { %1978 = vrot.lane.b32.xlu0 %v4252_v26, %s4082_s26 }
 0x578   :  { %2056 = vrot.lane.b32.xlu0 %v4249_v24, %s4082_s26 }
 0x581   :  { %v4392_v12 = vpop.f32.mrb[8].mxu1 }
 0x582   :  { %v3630_v13 = vpop.f32.mrb[9].mxu1 }
 0x585   :  { %v4394_v14 = vpop.f32.mrb[10].mxu1 }
 0x586   :  { %v3635_v15 = vpop.f32.mrb[11].mxu1 }
 0x589   :  { %v4396_v16 = vpop.f32.mrb[12].mxu1 }
 0x58a   :  { %v3640_v17 = vpop.f32.mrb[13].mxu1 }
 0x590   :  { %v1035_v19 = vpop.f32.mrb[14].mxu1 }
 0x591   :  { %v3650_v20 = vpop.f32.mrb[15].mxu1  ;;  %v1273_v27 = vsel %vm290_vm2, %v1035_v19, -inf }
 0x594   :  { %v1191_v21 = vpop.f32.mrb[16].mxu1 }
 0x595   :  { %v3660_v23 = vpop.f32.mrb[17].mxu1  ;;  %v1279_v25 = vsel %vm290_vm2, %v1191_v21, -inf }
 0x596   :  { %1280 = vmax.xlane.f32.xlu1 %v1279_v25 }
 0x597   :  { %1274 = vmax.xlane.f32.xlu0 %v1273_v27 }
 0x5a7   :  { %1321 = vrot.lane.b32.xlu1 %v4256_v30, %s4081_s25 }
 0x5df   :  { %v1302_v29 = vpop.xlane.xlu0 %1301 }
 0x5e0   :  { %3860 = vrcp.f32 %v1302_v29 }
 0x5e3   :  { %v1308_v31 = vpop.xlane.xlu0 %1307 }
 0x5e4   :  { %3862 = vrcp.f32 %v1308_v31 }
 0x5e7   :  { %v1550_v37 = vpop.permute.xlu0 %1549 }
 0x5ea   :  { %v3861_v33 = vpop.eup %3860 }
 0x5eb   :  { %v1318_v36 = vmul.f32 %v3861_v33, %v3857_v8  ;;  %v1901_v42 = vpop.permute.xlu0 %1900  ;;  %v1625_v33 = vld [vmem:[#allocation10 + $0x8] sm:$0xff] }
 0x5ed   :  { %3674 = vmatmul.mubr.msk.f32.vlgmr.msra.gmra.mrb[18].mxu0 %vm290_vm2, %v1318_v36 }
 0x5ee   :  { %v3863_v38 = vpop.eup %3862  ;;  %3682 = vmatpush3.msra.mxu0 %v1550_v37  ;;  %3683 = vmatprep.mubr.msk.f32.mxu0 %vm4076_vm1, %v4075_v18 }
 0x5ef   :  { %v1320_v40 = vmul.f32 %v3863_v38, %v3859_v10  ;;  %3702 = vmatprep.subr.mxu0 %v4075_v18  ;;  %v1979_v48 = vpop.permute.xlu0 %1978 }
 0x5f1   :  { %3684 = vmatmul.mubr.msk.f32.vlgmr.msra.gmra.mrb[20].mxu0 %vm290_vm2, %v1320_v40 }
 0x5f2   :  { %3704 = vmatprep.mubr.msk.f32.mxu0 %vm4076_vm1, %v4075_v18 }
 0x5f3   :  { %v2057_v51 = vpop.permute.xlu0 %2056 }
 0x5f5   :  { %3703 = vmatpush3.xpose.msk.msra.mxu0 %vm290_vm2, %v1823_v35  ;;  %v960_v35 = vld [vmem:[#allocation10] sm:$0xff] }
 0x5f6   :  { %3707 = vmatprep.subr.mxu0 %v4075_v18 }
 0x5f8   :  { %3705 = vmatmul.mubr.msk.f32.vlgmr.msra.gmra.mrb[22].mxu0 %vm290_vm2, %v1821_v41 }
 0x5f9   :  { %3708 = vmatpush3.xpose.msk.msra.mxu0 %vm290_vm2, %v1901_v42  ;;  %3709 = vmatprep.mubr.msk.f32.mxu0 %vm4076_vm1, %v4075_v18 }
 0x5fa   :  { %3712 = vmatprep.subr.mxu0 %v4075_v18 }
 0x5fc   :  { %3710 = vmatmul.mubr.msk.f32.vlgmr.msra.gmra.mrb[24].mxu0 %vm290_vm2, %v1899_v43 }
 0x5fd   :  { %3713 = vmatpush3.xpose.msk.msra.mxu0 %vm290_vm2, %v1979_v48  ;;  %3714 = vmatprep.mubr.msk.f32.mxu0 %vm4076_vm1, %v4075_v18 }
 0x5fe   :  { %3717 = vmatprep.subr.mxu0 %v4075_v18 }
 0x600   :  { %3715 = vmatmul.mubr.msk.f32.vlgmr.msra.gmra.mrb[26].mxu0 %vm290_vm2, %v1977_v49 }
 0x601   :  { %3718 = vmatpush3.xpose.msk.msra.mxu0 %vm290_vm2, %v2057_v51  ;;  %3719 = vmatprep.mubr.msk.f32.mxu0 %vm4076_vm1, %v4075_v18 }
 0x602   :  { %3727 = vmatprep.subr.mxu0 %v4075_v18 }
 0x604   :  { %3720 = vmatmul.mubr.msk.f32.vlgmr.msra.gmra.mrb[28].mxu0 %vm290_vm2, %v2055_v52 }
 0x605   :  { %3729 = vmatprep.mubr.msk.f32.mxu0 %vm4076_vm1, %v4075_v18 }
 0x623   :  { %v1281_v53 = vpop.xlane.xlu1 %1280 }
 0x624   :  { %v1287_v54 = vsub.f32 %v1191_v21, %v1281_v53  ;;  %v1275_v55 = vpop.xlane.xlu0 %1274 }
 0x625   :  { %v1285_v56 = vsub.f32 %v1035_v19, %v1275_v55 }
 0x626   :  { %v1293_v57 = vmul.f32 1.442695, %v1287_v54 }
 0x627   :  { %v1289_v58 = vmul.f32 1.442695, %v1285_v56  ;;  %v1322_v59 = vpop.permute.xlu1 %1321 }
 0x628   :  { %3667 = vmatpush3.msra.mxu1 %v1322_v59 }
 0x629   :  { %3864 = vpow2.f32 %v1289_v58  ;;  %3676 = vmatprep.subr.mxu1 %v4075_v18 }
 0x62a   :  { %3866 = vpow2.f32 %v1293_v57 }
 0x633   :  { %v3865_v60 = vpop.eup %3864 }
 0x634   :  { %v1297_v61 = vsel %vm290_vm2, %v3865_v60, 0.0  ;;  %v3867_v62 = vpop.eup %3866 }
 0x635   :  { %1298 = vadd.xlane.f32.xlu0 %v1297_v61  ;;  %v1303_v63 = vsel %vm290_vm2, %v3867_v62, 0.0 }
 0x639   :  { %1304 = vadd.xlane.f32.xlu0 %v1303_v63 }
 0x64f   :  { %1473 = vrot.lane.b32.xlu0 %v4260_v34, %s4081_s25 }
 0x6c0   :  { %v4434_v0 = vpop.f32.mrb[18].mxu0 }
 0x6c1   :  { %v3675_v1 = vpop.f32.mrb[19].mxu0 }
 0x6c2   :  { %v1299_v2 = vpop.xlane.xlu0 %1298 }
 0x6c3   :  { %3868 = vrcp.f32 %v1299_v2 }
 0x6c4   :  { %v4436_v3 = vpop.f32.mrb[20].mxu0 }
 0x6c5   :  { %v3685_v4 = vpop.f32.mrb[21].mxu0 }
 0x6c6   :  { %v1305_v5 = vpop.xlane.xlu0 %1304 }
 0x6c7   :  { %3870 = vrcp.f32 %v1305_v5 }
 0x6ca   :  { %v1474_v13 = vpop.permute.xlu0 %1473 }
 0x6cb   :  { %v1894_v6 = vpop.f32.mrb[22].mxu0 }
 0x6cc   :  { %v3706_v7 = vpop.f32.mrb[23].mxu0  ;;  %v2132_v8 = vsel %vm290_vm2, %v1894_v6, -inf }
 0x6cd   :  { %v3869_v9 = vpop.eup %3868  ;;  %2133 = vmax.xlane.f32.xlu1 %v2132_v8 }
 0x6ce   :  { %v1317_v10 = vmul.f32 %v3869_v9, %v3865_v60 }
 0x6cf   :  { %v1972_v11 = vpop.f32.mrb[24].mxu0 }
 0x6d0   :  { %v3711_v15 = vpop.f32.mrb[25].mxu0  ;;  %v2135_v17 = vsel %vm290_vm2, %v1972_v11, -inf  ;;  %3669 = vmatmul.mubr.msk.f32.vlgmr.msra.gmra.mrb[18].mxu1 %vm290_vm2, %v1317_v10 }
 0x6d1   :  { %v3871_v19 = vpop.eup %3870  ;;  %2136 = vmax.xlane.f32.xlu0 %v2135_v17  ;;  %3677 = vmatpush3.msra.mxu1 %v1474_v13 }
 0x6d2   :  { %v1319_v20 = vmul.f32 %v3871_v19, %v3867_v62  ;;  %3678 = vmatprep.mubr.msk.f32.mxu1 %vm4076_vm1, %v4075_v18  ;;  %3686 = vmatprep.subr.mxu1 %v1625_v33 }
 0x6d3   :  { %v2050_v21 = vpop.f32.mrb[26].mxu0 }
 0x6d4   :  { %v3716_v23 = vpop.f32.mrb[27].mxu0  ;;  %v2138_v25 = vsel %vm290_vm2, %v2050_v21, -inf  ;;  %3679 = vmatmul.mubr.msk.f32.vlgmr.msra.gmra.mrb[20].mxu1 %vm290_vm2, %v1319_v20 }
 0x6d5   :  { %2139 = vmax.xlane.f32.xlu1 %v2138_v25  ;;  %3687 = vmatpush3.msra.mxu1 %v1625_v33 }
 0x6d6   :  { %3694 = vmatprep.subr.mxu1 %v960_v35 }
 0x6d7   :  { %v2128_v27 = vpop.f32.mrb[28].mxu0 }
 0x6d8   :  { %v3721_v29 = vpop.f32.mrb[29].mxu0  ;;  %v2141_v31 = vsel %vm290_vm2, %v2128_v27, -inf }
 0x6d9   :  { %2142 = vmax.xlane.f32.xlu0 %v2141_v31 }
 0x6e6   :  { %2180 = vrot.lane.b32.xlu1 %v4256_v30, %s4084_s29 }
 0x75a   :  { %v2134_v36 = vpop.xlane.xlu1 %2133 }
 0x75b   :  { %v2144_v37 = vsub.f32 %v1894_v6, %v2134_v36 }
 0x75d   :  { %v2148_v38 = vmul.f32 1.442695, %v2144_v37 }
 0x75e   :  { %v2137_v40 = vpop.xlane.xlu0 %2136 }
 0x75f   :  { %3872 = vpow2.f32 %v2148_v38  ;;  %v2145_v41 = vsub.f32 %v1972_v11, %v2137_v40 }
 0x761   :  { %v2150_v42 = vmul.f32 1.442695, %v2145_v41 }
 0x762   :  { %v2140_v43 = vpop.xlane.xlu1 %2139 }
 0x763   :  { %3874 = vpow2.f32 %v2150_v42  ;;  %v2146_v48 = vsub.f32 %v2050_v21, %v2140_v43 }
 0x765   :  { %v2152_v49 = vmul.f32 1.442695, %v2146_v48 }
 0x766   :  { %v2143_v51 = vpop.xlane.xlu0 %2142 }
 0x767   :  { %3876 = vpow2.f32 %v2152_v49  ;;  %v2147_v52 = vsub.f32 %v2128_v27, %v2143_v51 }
 0x769   :  { %v3873_v53 = vpop.eup %3872  ;;  %v2154_v54 = vmul.f32 1.442695, %v2147_v52 }
 0x76a   :  { %v2156_v55 = vsel %vm290_vm2, %v3873_v53, 0.0 }
 0x76b   :  { %3878 = vpow2.f32 %v2154_v54  ;;  %2157 = vadd.xlane.f32.xlu1 %v2156_v55 }
 0x76d   :  { %v3875_v56 = vpop.eup %3874 }
 0x76e   :  { %v2159_v57 = vsel %vm290_vm2, %v3875_v56, 0.0 }
 0x76f   :  { %2160 = vadd.xlane.f32.xlu0 %v2159_v57 }
 0x771   :  { %v4450_v58 = vpop.eup %3876 }
 0x772   :  { %v2162_v59 = vsel %vm290_vm2, %v4450_v58, 0.0 }
 0x773   :  { %2163 = vadd.xlane.f32.xlu1 %v2162_v59 }
 0x775   :  { %v4454_v60 = vpop.eup %3878 }
 0x776   :  { %v2165_v61 = vsel %vm290_vm2, %v4454_v60, 0.0 }
 0x777   :  { %2166 = vadd.xlane.f32.xlu0 %v2165_v61 }
 0x784   :  { %2332 = vrot.lane.b32.xlu1 %v4260_v34, %s4084_s29 }
 0x788   :  { %2408 = vrot.lane.b32.xlu1 %v4258_v32, %s4084_s29 }
 0x78c   :  { %2586 = vrot.lane.b32.xlu1 %v4262_v39, %s4085_s1 }
 0x78d   :  { %2256 = vrot.lane.b32.xlu0 %v4254_v28, %s4084_s29 }
 0x790   :  { %2664 = vrot.lane.b32.xlu1 %v4265_v44, %s4085_s1 }
 0x791   :  { %2588 = vrot.lane.b32.xlu0 %v4245_v22, %s4086_s28 }
 0x794   :  { %2822 = vrot.lane.b32.xlu1 %v4249_v24, %s4086_s28  ;;  %v2181_v24 = vpop.permute.xlu1 %2180 }
 0x795   :  { %2666 = vrot.lane.b32.xlu0 %v4274_v47, %s4086_s28 }
 0x798   :  { %2820 = vrot.lane.b32.xlu1 %v4269_v46, %s4085_s1 }
 0x799   :  { %2744 = vrot.lane.b32.xlu0 %v4252_v26, %s4086_s28 }
 0x79d   :  { %2742 = vrot.lane.b32.xlu0 %v4267_v45, %s4085_s1 }
 0x7a3   :  { %v1393_v62 = vpop.f32.mrb[18].mxu1 }
 0x7a4   :  { %v3670_v39 = vpop.f32.mrb[19].mxu1  ;;  %3688 = vmatprep.mubr.msk.f32.mxu1 %vm290_vm2, %v1393_v62 }
 0x7a5   :  { %3689 = vmatmul.mubr.msk.f32.vlgmr.msra.gmra.mrb[22].mxu1 %vm290_vm2, %v4434_v0 }
 0x7a6   :  { %3695 = vmatpush3.msra.mxu1 %v960_v35 }
 0x7a7   :  { %v1545_v44 = vpop.f32.mrb[20].mxu1  ;;  %3722 = vmatprep.subr.mxu1 %v4075_v18 }
 0x7a8   :  { %v3680_v22 = vpop.f32.mrb[21].mxu1  ;;  %3691 = vmatprep.mubr.msk.f32.mxu1 %vm290_vm2, %v1545_v44 }
 0x7a9   :  { %3692 = vmatmul.mubr.msk.f32.gmra.mrb[24].mxu1 %vm290_vm2, %v4436_v3 }
 0x7aa   :  { %3696 = vmatprep.mubr.msk.f32.mxu1 %vm290_vm2, %v4392_v12 }
 0x7ad   :  { %3697 = vmatmul.mubr.msk.f32.vlgmr.msra.gmra.mrb[22].mxu1 %vm290_vm2, %v4394_v14 }
 0x7ae   :  { %3723 = vmatpush3.msra.mxu1 %v2181_v24  ;;  %3699 = vmatprep.mubr.msk.f32.mxu1 %vm290_vm2, %v4396_v16  ;;  %v2484_v16 = vld [vmem:[#allocation10 + $0x10] sm:$0xff] }
 0x7af   :  { %3732 = vmatprep.subr.mxu1 %v4075_v18 }
 0x7b1   :  { %3700 = vmatmul.mubr.msk.f32.gmra.mrb[24].mxu1 %vm290_vm2, %v4352_v50 }
 0x7b2   :  { %3724 = vmatprep.mubr.msk.f32.mxu1 %vm4076_vm1, %v4075_v18 }
 0x7f8   :  { %v2158_v26 = vpop.xlane.xlu1 %2157 }
 0x7f9   :  { %3880 = vrcp.f32 %v2158_v26 }
 0x7fc   :  { %v2161_v45 = vpop.xlane.xlu0 %2160 }
 0x7fd   :  { %3882 = vrcp.f32 %v2161_v45 }
 0x800   :  { %v2164_v46 = vpop.xlane.xlu1 %2163 }
 0x801   :  { %3884 = vrcp.f32 %v2164_v46 }
 0x803   :  { %v3881_v47 = vpop.eup %3880 }
 0x804   :  { %v2176_v12 = vmul.f32 %v3881_v47, %v3873_v53  ;;  %v2167_v14 = vpop.xlane.xlu0 %2166  ;;  %v2333_v63 = vpop.permute.xlu1 %2332 }
 0x805   :  { %3886 = vrcp.f32 %v2167_v14 }
 0x806   :  { %3725 = vmatmul.mubr.msk.f32.vlgmr.msra.gmra.mrb[26].mxu1 %vm290_vm2, %v2176_v12 }
 0x807   :  { %v3883_v0 = vpop.eup %3882  ;;  %3733 = vmatpush3.msra.mxu1 %v2333_v63  ;;  %3734 = vmatprep.mubr.msk.f32.mxu1 %vm4076_vm1, %v4075_v18 }
 0x808   :  { %v2177_v50 = vmul.f32 %v3883_v0, %v3875_v56  ;;  %v2257_v1 = vpop.permute.xlu0 %2256  ;;  %v2409_v2 = vpop.permute.xlu1 %2408  ;;  %3742 = vmatprep.subr.mxu1 %v2484_v16  ;;  %v3250_v0 = vld [vmem:[#allocation10 + $0x18] sm:$0xff] }
 0x809   :  { %3728 = vmatpush3.msra.mxu0 %v2257_v1 }
 0x80a   :  { %3730 = vmatmul.mubr.msk.f32.vlgmr.msra.gmra.mrb[30].mxu0 %vm290_vm2, %v2177_v50  ;;  %3737 = vmatprep.subr.mxu0 %v4075_v18 }
 0x80b   :  { %v3885_v3 = vpop.eup %3884  ;;  %3738 = vmatpush3.msra.mxu0 %v2409_v2  ;;  %3739 = vmatprep.mubr.msk.f32.mxu0 %vm4076_vm1, %v4075_v18 }
 0x80c   :  { %v2178_v4 = vmul.f32 %v3885_v3, %v4450_v58  ;;  %v2587_v5 = vpop.permute.xlu1 %2586  ;;  %3750 = vmatprep.subr.mxu0 %v4075_v18  ;;  %v2589_v8 = vpop.permute.xlu0 %2588 }
 0x80e   :  { %3735 = vmatmul.mubr.msk.f32.vlgmr.msra.gmra.mrb[28].mxu1 %vm290_vm2, %v2178_v4 }
 0x80f   :  { %v3887_v6 = vpop.eup %3886  ;;  %3743 = vmatpush3.msra.mxu1 %v2484_v16 }
 0x810   :  { %v2179_v7 = vmul.f32 %v3887_v6, %v4454_v60  ;;  %3760 = vmatprep.subr.mxu1 %v4075_v18  ;;  %v2665_v9 = vpop.permute.xlu1 %2664  ;;  %v2667_v10 = vpop.permute.xlu0 %2666 }
 0x812   :  { %3740 = vmatmul.mubr.msk.f32.vlgmr.msra.gmra.mrb[32].mxu0 %vm290_vm2, %v2179_v7 }
 0x813   :  { %3751 = vmatpush3.xpose.msk.msra.mxu0 %vm290_vm2, %v2589_v8  ;;  %3752 = vmatprep.mubr.msk.f32.mxu0 %vm4076_vm1, %v4075_v18 }
 0x814   :  { %3755 = vmatprep.subr.mxu0 %v4075_v18  ;;  %v2823_v11 = vpop.permute.xlu1 %2822  ;;  %v2745_v20 = vpop.permute.xlu0 %2744 }
 0x816   :  { %3753 = vmatmul.mubr.msk.f32.vlgmr.msra.gmra.mrb[34].mxu0 %vm290_vm2, %v2587_v5 }
 0x817   :  { %3756 = vmatpush3.xpose.msk.msra.mxu0 %vm290_vm2, %v2667_v10  ;;  %3757 = vmatprep.mubr.msk.f32.mxu0 %vm4076_vm1, %v4075_v18 }
 0x818   :  { %3765 = vmatprep.subr.mxu0 %v4075_v18  ;;  %v2821_v13 = vpop.permute.xlu1 %2820  ;;  %v2743_v31 = vpop.permute.xlu0 %2742 }
 0x81a   :  { %3758 = vmatmul.mubr.msk.f32.vlgmr.msra.gmra.mrb[36].mxu0 %vm290_vm2, %v2665_v9 }
 0x81b   :  { %3766 = vmatpush3.xpose.msk.msra.mxu0 %vm290_vm2, %v2823_v11  ;;  %3767 = vmatprep.mubr.msk.f32.mxu0 %vm4076_vm1, %v4075_v18 }
 0x81c   :  { %3775 = vmatprep.subr.mxu0 %v4075_v18 }
 0x81e   :  { %3768 = vmatmul.mubr.msk.f32.vlgmr.msra.gmra.mrb[38].mxu0 %vm290_vm2, %v2821_v13 }
 0x81f   :  { %3777 = vmatprep.mubr.msk.f32.mxu0 %vm4076_vm1, %v4075_v18 }
 0x8d9   :  { %v2252_v15 = vpop.f32.mrb[26].mxu1 }
 0x8da   :  { %v3726_v17 = vpop.f32.mrb[27].mxu1  ;;  %3744 = vmatprep.mubr.msk.f32.mxu1 %vm290_vm2, %v2252_v15 }
 0x8dd   :  { %v2328_v19 = vpop.f32.mrb[30].mxu0 }
 0x8de   :  { %v3731_v21 = vpop.f32.mrb[31].mxu0  ;;  %3745 = vmatmul.mubr.msk.f32.vlgmr.msra.gmra.mrb[22].mxu1 %vm290_vm2, %v2328_v19 }
 0x8df   :  { %3761 = vmatpush3.xpose.msk.msra.mxu1 %vm290_vm2, %v2745_v20 }
 0x8e0   :  { %3770 = vmatprep.subr.mxu1 %v4075_v18 }
 0x8e1   :  { %v2404_v23 = vpop.f32.mrb[28].mxu1 }
 0x8e2   :  { %v3736_v25 = vpop.f32.mrb[29].mxu1  ;;  %3747 = vmatprep.mubr.msk.f32.mxu1 %vm290_vm2, %v2404_v23 }
 0x8e5   :  { %v2480_v27 = vpop.f32.mrb[32].mxu0 }
 0x8e6   :  { %v3741_v29 = vpop.f32.mrb[33].mxu0  ;;  %3748 = vmatmul.mubr.msk.f32.gmra.mrb[24].mxu1 %vm290_vm2, %v2480_v27 }
 0x8e7   :  { %3762 = vmatprep.mubr.msk.f32.mxu1 %vm4076_vm1, %v4075_v18 }
 0x8e9   :  { %v2660_v33 = vpop.f32.mrb[34].mxu0 }
 0x8ea   :  { %v3754_v35 = vpop.f32.mrb[35].mxu0  ;;  %3763 = vmatmul.mubr.msk.f32.vlgmr.msra.gmra.mrb[30].mxu1 %vm290_vm2, %v2743_v31  ;;  %v2898_v36 = vsel %vm290_vm2, %v2660_v33, -inf }
 0x8eb   :  { %2899 = vmax.xlane.f32.xlu0 %v2898_v36  ;;  %3772 = vmatprep.mubr.msk.f32.mxu1 %vm4076_vm1, %v4075_v18 }
 0x8ed   :  { %v2738_v37 = vpop.f32.mrb[36].mxu0 }
 0x8ee   :  { %v3759_v38 = vpop.f32.mrb[37].mxu0  ;;  %v2901_v40 = vsel %vm290_vm2, %v2738_v37, -inf }
 0x8ef   :  { %2902 = vmax.xlane.f32.xlu1 %v2901_v40 }
 0x8f1   :  { %v2894_v41 = vpop.f32.mrb[38].mxu0 }
 0x8f2   :  { %v3769_v42 = vpop.f32.mrb[39].mxu0  ;;  %v2907_v59 = vsel %vm290_vm2, %v2894_v41, -inf }
 0x978   :  { %v2900_v43 = vpop.xlane.xlu0 %2899 }
 0x979   :  { %v2910_v48 = vsub.f32 %v2660_v33, %v2900_v43 }
 0x97b   :  { %v2914_v49 = vmul.f32 1.442695, %v2910_v48 }
 0x97c   :  { %v2903_v53 = vpop.xlane.xlu1 %2902 }
 0x97d   :  { %3888 = vpow2.f32 %v2914_v49  ;;  %v2911_v54 = vsub.f32 %v2738_v37, %v2903_v53 }
 0x97f   :  { %v2916_v55 = vmul.f32 1.442695, %v2911_v54 }
 0x981   :  { %3890 = vpow2.f32 %v2916_v55 }
 0x987   :  { %v3889_v51 = vpop.eup %3888 }
 0x988   :  { %v2922_v52 = vsel %vm290_vm2, %v3889_v51, 0.0 }
 0x989   :  { %2923 = vadd.xlane.f32.xlu1 %v2922_v52 }
 0x98b   :  { %v3891_v60 = vpop.eup %3890 }
 0x98c   :  { %v2925_v61 = vsel %vm290_vm2, %v3891_v60, 0.0 }
 0x99a   :  { %2946 = vrot.lane.b32.xlu1 %v4256_v30, %s4087_s0 }
 0x99e   :  { %3098 = vrot.lane.b32.xlu1 %v4260_v34, %s4087_s0 }
 0x9bd   :  { %v2816_v56 = vpop.f32.mrb[30].mxu1 }
 0x9be   :  { %v3764_v57 = vpop.f32.mrb[31].mxu1  ;;  %v2904_v58 = vsel %vm290_vm2, %v2816_v56, -inf }
 0x9bf   :  { %2905 = vmax.xlane.f32.xlu0 %v2904_v58 }
 0x9c3   :  { %2908 = vmax.xlane.f32.xlu0 %v2907_v59 }
 0x9c7   :  { %2926 = vadd.xlane.f32.xlu0 %v2925_v61 }
 0xa16   :  { %v2924_v30 = vpop.xlane.xlu1 %2923 }
 0xa17   :  { %3892 = vrcp.f32 %v2924_v30 }
 0xa1a   :  { %v2947_v62 = vpop.permute.xlu1 %2946 }
 0xa1b   :  { %3771 = vmatpush3.msra.mxu1 %v2947_v62 }
 0xa1c   :  { %3780 = vmatprep.subr.mxu1 %v4075_v18 }
 0xa1e   :  { %v3099_v44 = vpop.permute.xlu1 %3098 }
 0xa21   :  { %v3893_v34 = vpop.eup %3892 }
 0xa22   :  { %v2942_v39 = vmul.f32 %v3893_v34, %v3889_v51 }
 0xa24   :  { %3773 = vmatmul.mubr.msk.f32.vlgmr.msra.gmra.mrb[32].mxu1 %vm290_vm2, %v2942_v39 }
 0xa25   :  { %3781 = vmatpush3.msra.mxu1 %v3099_v44  ;;  %3782 = vmatprep.mubr.msk.f32.mxu1 %vm4076_vm1, %v4075_v18 }
 0xa26   :  { %3790 = vmatprep.subr.mxu1 %v3250_v0 }
 0xa4c   :  { %v2906_v22 = vpop.xlane.xlu0 %2905 }
 0xa4d   :  { %v2912_v24 = vsub.f32 %v2816_v56, %v2906_v22 }
 0xa4f   :  { %v2918_v26 = vmul.f32 1.442695, %v2912_v24 }
 0xa50   :  { %v2909_v45 = vpop.xlane.xlu0 %2908 }
 0xa51   :  { %3894 = vpow2.f32 %v2918_v26  ;;  %v2913_v46 = vsub.f32 %v2894_v41, %v2909_v45 }
 0xa53   :  { %v2920_v47 = vmul.f32 1.442695, %v2913_v46 }
 0xa54   :  { %v2927_v50 = vpop.xlane.xlu0 %2926 }
 0xa55   :  { %3896 = vpow2.f32 %v2920_v47 }
 0xa56   :  { %3898 = vrcp.f32 %v2927_v50 }
 0xa5b   :  { %v3895_v12 = vpop.eup %3894 }
 0xa5c   :  { %v2928_v14 = vsel %vm290_vm2, %v3895_v12, 0.0 }
 0xa5d   :  { %2929 = vadd.xlane.f32.xlu1 %v2928_v14 }
 0xa5f   :  { %v3897_v63 = vpop.eup %3896 }
 0xa60   :  { %v2931_v16 = vsel %vm290_vm2, %v3897_v63, 0.0  ;;  %v3899_v3 = vpop.eup %3898 }
 0xa61   :  { %2932 = vadd.xlane.f32.xlu0 %v2931_v16  ;;  %v2943_v4 = vmul.f32 %v3899_v3, %v3891_v60 }
 0xa6e   :  { %3174 = vrot.lane.b32.xlu1 %v4258_v32, %s4087_s0 }
 0xa77   :  { %3022 = vrot.lane.b32.xlu0 %v4254_v28, %s4087_s0 }
 0xaea   :  { %v2930_v1 = vpop.xlane.xlu1 %2929 }
 0xaeb   :  { %3900 = vrcp.f32 %v2930_v1 }
 0xaee   :  { %v2933_v2 = vpop.xlane.xlu0 %2932  ;;  %v3175_v6 = vpop.permute.xlu1 %3174 }
 0xaef   :  { %3902 = vrcp.f32 %v2933_v2 }
 0xaf2   :  { %v3023_v5 = vpop.permute.xlu0 %3022 }
 0xaf3   :  { %3776 = vmatpush3.msra.mxu0 %v3023_v5 }
 0xaf4   :  { %3778 = vmatmul.mubr.msk.f32.vlgmr.msra.gmra.mrb[40].mxu0 %vm290_vm2, %v2943_v4  ;;  %3785 = vmatprep.subr.mxu0 %v4075_v18 }
 0xaf5   :  { %v3901_v32 = vpop.eup %3900  ;;  %3786 = vmatpush3.msra.mxu0 %v3175_v6  ;;  %3787 = vmatprep.mubr.msk.f32.mxu0 %vm4076_vm1, %v4075_v18 }
 0xaf6   :  { %v2944_v28 = vmul.f32 %v3901_v32, %v3895_v12 }
 0xaf7   :  { %v3018_v7 = vpop.f32.mrb[32].mxu1 }
 0xaf8   :  { %v3774_v8 = vpop.f32.mrb[33].mxu1  ;;  %3783 = vmatmul.mubr.msk.f32.vlgmr.msra.gmra.mrb[34].mxu1 %vm290_vm2, %v2944_v28 }
 0xaf9   :  { %v3903_v9 = vpop.eup %3902  ;;  %3792 = vmatprep.mubr.msk.f32.mxu1 %vm290_vm2, %v3018_v7  ;;  %3791 = vmatpush3.msra.mxu1 %v3250_v0 }
 0xafa   :  { %v2945_v10 = vmul.f32 %v3903_v9, %v3897_v63 }
 0xafc   :  { %3788 = vmatmul.mubr.msk.f32.vlgmr.msra.gmra.mrb[42].mxu0 %vm290_vm2, %v2945_v10 }
 0xbc7   :  { %v3094_v11 = vpop.f32.mrb[40].mxu0 }
 0xbc8   :  { %v3779_v13 = vpop.f32.mrb[41].mxu0  ;;  %3793 = vmatmul.mubr.msk.f32.vlgmr.msra.gmra.mrb[22].mxu1 %vm290_vm2, %v3094_v11 }
 0xbcb   :  { %v3170_v15 = vpop.f32.mrb[34].mxu1 }
 0xbcc   :  { %v3784_v17 = vpop.f32.mrb[35].mxu1  ;;  %3795 = vmatprep.mubr.msk.f32.mxu1 %vm290_vm2, %v3170_v15 }
 0xbcf   :  { %v3246_v18 = vpop.f32.mrb[42].mxu0 }
 0xbd0   :  { %v3789_v19 = vpop.f32.mrb[43].mxu0  ;;  %3796 = vmatmul.mubr.msk.f32.gmra.mrb[24].mxu1 %vm290_vm2, %v3246_v18 }
 0xbd1   :  { %4025 = shalt.err (!%p4022_p2)
}
 0xbd2   :  { %s4026_s15 = scalar_lea.hbm %s4606_s8, 512 }
 0xbd3   :  { %p4027_p3 = scmp.ne.s32.totalorder %s4606_s8, %s4026_s15  ;;  %p4030_p4 = scmp.lt.u32.totalorder %s4026_s15, %s4606_s8 }
 0xbd5   :  { %p4032_p5 = pnand %p4030_p4, %p4027_p3 }
 0xbd7   :  { %4035 = shalt.err (!%p4032_p5)
}
 0xbd8   :  { %3390 = dma.vmem_to_hbm [thread:$0]  %s3385_s10, 512, %s4606_s8, [#allocation13], %s4070_s17, %s4070_s17, %s4071_s18  }
 0xbd9   :  { %v3479_v20 = vld [vmem:[%s4604_s6] ss:$0 sm:$0xff]  ;;  %s4089_s30 = smov [#allocation11]  }
 0xbda   :  { %s3372_s4 = sshll.u32 %s4089_s30, 4  ;;  %s3373_s4 = int_to_ptr.vmem [resolvable:$true] %s3372_s4 }
 0xbdb   :  { %s4036_s6 = scalar_lea.vmem %s3373_s4, 512  ;;  %p4041_p7 = scmp.lt.s32.totalorder %s3373_s4, %s3373_s4 }
 0xbdc   :  { %p4037_p6 = scmp.ne.s32.totalorder %s3373_s4, %s4036_s6  ;;  %p4042_p8 = scmp.lt.s32.totalorder %s4036_s6, %s4036_s6 }
 0xbde   :  { %p4043_p9 = por %p4042_p8, %p4041_p7 }
 0xbe0   :  { %p4044_p10 = pnand %p4043_p9, %p4037_p6 }
 0xc9b   :  { %v3794_v21 = vpop.f32.mrb[22].mxu1 }
 0xc9c   :  { %v3360_v23 = vadd.f32 %v3794_v21, %v3479_v20  ;;  %v3329_v25 = vpop.f32.mrb[23].mxu1 }
 0xc9d   :  { %v3359_v27 = vadd.f32 %v3479_v20, %v3329_v25 }
 0xc9e   :  { %3364 = vst.msk [vmem:[#allocation11 + $0x8] sm:$0xff] %vm121_vm0, %v3360_v23 }
 0xc9f   :  { %3363 = vst.msk [vmem:[#allocation11] sm:$0xff] %vm121_vm0, %v3359_v27 }
 0xca3   :  { %v3797_v29 = vpop.f32.mrb[24].mxu1 }
 0xca4   :  { %v3362_v31 = vadd.f32 %v3797_v29, %v3479_v20  ;;  %v3339_v33 = vpop.f32.mrb[25].mxu1 }
 0xca5   :  { %v3361_v35 = vadd.f32 %v3479_v20, %v3339_v33 }
 0xca6   :  { %3366 = vst.msk [vmem:[#allocation11 + $0x18] sm:$0xff] %vm121_vm0, %v3362_v31 }
 0xca7   :  { %3365 = vst.msk [vmem:[#allocation11 + $0x10] sm:$0xff] %vm121_vm0, %v3361_v35 }
 0xca8   :  { %4047 = shalt.err (!%p4044_p10)
}
 0xca9   :  { %s4048_s23 = scalar_lea.hbm %s4605_s7, 512 }
 0xcaa   :  { %p4049_p11 = scmp.ne.s32.totalorder %s4605_s7, %s4048_s23  ;;  %p4052_p12 = scmp.lt.u32.totalorder %s4048_s23, %s4605_s7 }
 0xcac   :  { %p4054_p13 = pnand %p4052_p12, %p4049_p11 }
 0xcae   :  { %4057 = shalt.err (!%p4054_p13)
}
 0xcaf   :  { %3378 = dma.vmem_to_hbm [thread:$0]  %s3373_s4, 512, %s4605_s7, [#allocation4], %s4070_s17, %s4070_s17, %s4071_s18  }
 0xcb0   :  { %4064 = dma.done.wait [#allocation4], 512  }
 0xcb1   :  { %4065 = vsyncadd [#allocation4], 4294966784 }
 0xcb2   :  { %4066 = dma.done.wait [#allocation13], 512  }
 0xcb3   :  { %4067 = vsyncadd [#allocation13], 4294966784 }
 0xcb4   :  { %3397 = vsyncpa [#allocation3], 1 }
 0xcb5   :  { %3398 = vsyncpa [#allocation6], 1 }
 0xcb6   :  { %3399 = vsyncpa [#allocation9], 1 }
 0xcb7   :  { %3400 = vsyncpa [#allocation4], 1 }
 0xcb8   :  { %3401 = vsyncpa [#allocation13], 1 }

</bundles_post_ra>
